<compile_context>
chip_gen: v6e
topology: v6e:2x2x1
jax: 0.10.0
libtpu: 0.0.40
codegen_flags: <defaults>
</compile_context>

<pallas_src>
import jax
import jax.numpy as jnp
from jax.experimental import pallas as pl
from jax.experimental.pallas import tpu as pltpu

_SELU_ALPHA = 1.6732632423543772848170429916717
_SELU_SCALE = 1.0507009873554804934193349852946
_GN_EPS = 1e-5


def _make_tca_kernel(C, H, W, d):
    """Builds the fully fused TCA kernel for fixed (C, H, W, dilation d)."""
    HW = H * W
    inv_hw = 1.0 / float(HW)

    def tap_shifts(dil):
        # flattened-index delta of tap (kh, kw): (kh-1)*dil rows + (kw-1)*dil cols
        return [((kh - 1) * dil) * W + (kw - 1) * dil
                for kh in range(3) for kw in range(3)]

    s1 = tap_shifts(1)          # dense conv (pad 1) and depthwise (pad 1)
    sd = tap_shifts(d)          # dilated depthwise (pad d, dilation d)

    def shifted(v, s):
        # tap[p] = v[p + s]; wrapped positions are zeroed later by the mask.
        if s % HW == 0:
            return v
        return pltpu.roll(v, (-s) % HW, axis=1)   # XLU lane rotation

    def gn_selu(x, gamma, beta):
        # Per-channel GroupNorm (num_groups == C) + SELU on a (C, HW) tile.
        s = jnp.sum(x, axis=-1, keepdims=True)          # (C, 1)
        ss = jnp.sum(x * x, axis=-1, keepdims=True)     # (C, 1)  one pass each
        mean = s * inv_hw
        var = jnp.maximum(ss * inv_hw - mean * mean, 0.0)
        scale = gamma * jax.lax.rsqrt(var + _GN_EPS)    # fold gamma into scale
        shift = beta - mean * scale
        y = x * scale + shift
        neg = _SELU_ALPHA * (jnp.exp(jnp.minimum(y, 0.0)) - 1.0)   # guarded exp
        return _SELU_SCALE * jnp.where(y > 0, y, neg)

    def kernel(x_ref, w1_ref, wdc_ref, wddc_ref, gb_ref, m_ref, o_ref, col_ref):
        x = x_ref[0]                                     # (C, HW), lane-dense

        # ---- dense 3x3 conv: roll+mask im2col staged in VMEM, one MXU dot ----
        for t in range(9):
            tap = shifted(x, s1[t])
            if s1[t] != 0:
                tap = tap * m_ref[t:t + 1, :]
            col_ref[t * C:(t + 1) * C, :] = tap          # (9C, HW) im2col tile
        br = jnp.dot(w1_ref[...], col_ref[...],
                     preferred_element_type=jnp.float32)  # (C, 9C) @ (9C, HW)
        br = gn_selu(br, gb_ref[:, 0:1], gb_ref[:, 1:2])

        # ---- depthwise 3x3 branches on the VPU (roll + mask, 3 partials) -----
        def dw(v, w_ref, sh, mbase):
            acc = [None, None, None]
            for t in range(9):
                tap = shifted(v, sh[t])
                if sh[t] != 0:
                    tap = tap * m_ref[mbase + t:mbase + t + 1, :]
                term = w_ref[:, t:t + 1] * tap           # per-channel weight
                j = t % 3
                acc[j] = term if acc[j] is None else acc[j] + term
            return (acc[0] + acc[1]) + acc[2]

        br1 = gn_selu(dw(br, wdc_ref, s1, 0), gb_ref[:, 2:3], gb_ref[:, 3:4])
        br2 = gn_selu(dw(br, wddc_ref, sd, 9), gb_ref[:, 4:5], gb_ref[:, 5:6])

        # ---- 3-way sum + final GN + SELU, lane-dense output store ------------
        o_ref[0] = gn_selu(br + br1 + br2, gb_ref[:, 6:7], gb_ref[:, 7:8])

    return kernel


def _tap_masks(H, W, d):
    """(18, H*W) boundary masks: rows 0-8 dilation 1, rows 9-17 dilation d."""
    hw = H * W
    idx = jnp.arange(hw, dtype=jnp.int32)
    h, w = idx // W, idx % W
    rows = []
    for dil in (1, d):
        for kh in range(3):
            for kw in range(3):
                dy, dx = (kh - 1) * dil, (kw - 1) * dil
                ok = ((h + dy >= 0) & (h + dy < H) &
                      (w + dx >= 0) & (w + dx < W))
                rows.append(ok.astype(jnp.float32))
    return jnp.stack(rows, axis=0)


def tca_forward(params, x, d=1):
    """Fused Pallas forward of the TCA block.  x: (N, C, H, W) float32."""
    N, C, H, W = x.shape
    HW = H * W
    assert d >= 1
    assert C < 32, "per-channel GroupNorm path (num_groups == C) only"

    kernel = _make_tca_kernel(C, H, W, d)

    xf = x.reshape(N, C, HW)                                   # contiguous, free
    # Dense conv weight (Cout, Cin, 3, 3) -> (Cout, 9*Cin), tap-major columns
    # matching the im2col row order (row = t*C + ci, t = kh*3 + kw).
    w1 = jnp.transpose(params["w_c3"], (0, 2, 3, 1)).reshape(C, 9 * C)
    # Depthwise weights (C, 1, 3, 3) -> (C, 9): channel in sublanes, tap in lanes.
    wdc = params["w_dc"].reshape(C, 9)
    wddc = params["w_ddc"].reshape(C, 9)
    # All four GroupNorm affine pairs packed as (C, 8).
    gb = jnp.stack([params["g_c3"], params["b_c3"],
                    params["g_dc"], params["b_dc"],
                    params["g_ddc"], params["b_ddc"],
                    params["g_bp"], params["b_bp"]], axis=1)
    masks = _tap_masks(H, W, d)                                # (18, HW)

    out = pl.pallas_call(
        kernel,
        out_shape=jax.ShapeDtypeStruct((N, C, HW), jnp.float32),
        grid=(N,),
        in_specs=[
            pl.BlockSpec((1, C, HW), lambda n: (n, 0, 0)),
            pl.BlockSpec((C, 9 * C), lambda n: (0, 0)),
            pl.BlockSpec((C, 9), lambda n: (0, 0)),
            pl.BlockSpec((C, 9), lambda n: (0, 0)),
            pl.BlockSpec((C, 8), lambda n: (0, 0)),
            pl.BlockSpec((18, HW), lambda n: (0, 0)),
        ],
        out_specs=pl.BlockSpec((1, C, HW), lambda n: (n, 0, 0)),
        scratch_shapes=[pltpu.VMEM((9 * C, HW), jnp.float32)],   # im2col tile
        compiler_params=pltpu.CompilerParams(
            dimension_semantics=("parallel",),
            vmem_limit_bytes=32 * 1024 * 1024),
    )(xf, w1, wdc, wddc, gb, masks)
    return out.reshape(N, C, H, W)


# ----------------------------- parameters ---------------------------------

def build_params(C, key):
    ks = jax.random.split(key, 11)
    p = {
        "w_c3": jax.random.normal(ks[0], (C, C, 3, 3), jnp.float32) * 0.3,
        "w_dc": jax.random.normal(ks[1], (C, 1, 3, 3), jnp.float32) * 0.3,
        "w_ddc": jax.random.normal(ks[2], (C, 1, 3, 3), jnp.float32) * 0.3,
    }
    for i, name in enumerate(("c3", "dc", "ddc", "bp")):
        p["g_" + name] = 1.0 + 0.1 * jax.random.normal(ks[3 + 2 * i], (C,), jnp.float32)
        p["b_" + name] = 0.1 * jax.random.normal(ks[4 + 2 * i], (C,), jnp.float32)
    return p


# ------------------------- pure-JAX reference ------------------------------

def tca_reference(params, x, d=1):
    C = x.shape[1]

    def conv(inp, w, groups=1, dil=1, pad=1):
        return jax.lax.conv_general_dilated(
            inp, w, window_strides=(1, 1),
            padding=((pad, pad), (pad, pad)),
            rhs_dilation=(dil, dil),
            feature_group_count=groups,
            dimension_numbers=("NCHW", "OIHW", "NCHW"),
            precision=jax.lax.Precision.HIGHEST)

    def gn_selu(t, g, b):
        m = jnp.mean(t, axis=(2, 3), keepdims=True)
        v = jnp.mean((t - m) ** 2, axis=(2, 3), keepdims=True)
        y = (t - m) * jax.lax.rsqrt(v + _GN_EPS)
        y = y * g[None, :, None, None] + b[None, :, None, None]
        return _SELU_SCALE * jnp.where(y > 0, y, _SELU_ALPHA * (jnp.exp(y) - 1.0))

    br = gn_selu(conv(x, params["w_c3"], pad=1), params["g_c3"], params["b_c3"])
    br1 = gn_selu(conv(br, params["w_dc"], groups=C, pad=1),
                  params["g_dc"], params["b_dc"])
    br2 = gn_selu(conv(br, params["w_ddc"], groups=C, dil=d, pad=d),
                  params["g_ddc"], params["b_ddc"])
    return gn_selu(br + br1 + br2, params["g_bp"], params["b_bp"])


# --------------------------------- main ------------------------------------

if __name__ == "__main__":
    N, C, H, W = 2, 4, 16, 16
    kp, kx = jax.random.split(jax.random.PRNGKey(0))
    params = build_params(C, kp)
    x = jax.random.normal(kx, (N, C, H, W), jnp.float32)

    tca_jit = jax.jit(tca_forward, static_argnames=("d",))
    for d in (1, 2):                 # default TCA(d=1) plus a dilated instance
        out = jax.block_until_ready(tca_jit(params, x, d=d))
        assert out.shape == (N, C, H, W), out.shape
        assert bool(jnp.all(jnp.isfinite(out)))
        ref = tca_reference(params, x, d=d)
        err = float(jnp.max(jnp.abs(out - ref)))
        # 2e-2 leaves headroom for the MXU's f32 matmul mode; any structural
        # error (taps / masks / weight packing) produces O(1) deviations.
        assert err < 2e-2, f"d={d}: max abs err vs reference = {err}"
    print("KERNEL_OK")
</pallas_src>

<mosaic_0001>
module attributes {stable_mosaic.version = 11 : i64} {
  func.func @kernel(%arg0: i32, %arg1: memref<1x4x256xf32, #tpu.memory_space<vmem>>, %arg2: memref<4x36xf32, #tpu.memory_space<vmem>>, %arg3: memref<4x9xf32, #tpu.memory_space<vmem>>, %arg4: memref<4x9xf32, #tpu.memory_space<vmem>>, %arg5: memref<4x8xf32, #tpu.memory_space<vmem>>, %arg6: memref<18x256xf32, #tpu.memory_space<vmem>>, %arg7: memref<1x4x256xf32, #tpu.memory_space<vmem>>, %arg8: memref<36x256xf32, #tpu.memory_space<vmem>>) attributes {dimension_semantics = [#tpu.dimension_semantics<parallel>], iteration_bounds = array<i64: 2>, scalar_prefetch = 0 : i64, scratch_operands = 1 : i64, tpu.core_type = #tpu.core_type<tc>, window_params = [{transform_indices = @transform_0, window_bounds = array<i64: 1, 4, 256>}, {pipeline_mode = #tpu.pipeline_mode<synchronous>, transform_indices = @transform_1, window_bounds = array<i64: 4, 36>}, {pipeline_mode = #tpu.pipeline_mode<synchronous>, transform_indices = @transform_2, window_bounds = array<i64: 4, 9>}, {pipeline_mode = #tpu.pipeline_mode<synchronous>, transform_indices = @transform_3, window_bounds = array<i64: 4, 9>}, {pipeline_mode = #tpu.pipeline_mode<synchronous>, transform_indices = @transform_4, window_bounds = array<i64: 4, 8>}, {pipeline_mode = #tpu.pipeline_mode<synchronous>, transform_indices = @transform_5, window_bounds = array<i64: 18, 256>}, {transform_indices = @transform_6, window_bounds = array<i64: 1, 4, 256>}]} {
    %c0 = arith.constant 0 : index
    %c0_0 = arith.constant 0 : index
    %c0_1 = arith.constant 0 : index
    %0 = vector.load %arg1[%c0, %c0_0, %c0_1] : memref<1x4x256xf32, #tpu.memory_space<vmem>>, vector<1x4x256xf32>
    %1 = vector.shape_cast %0 : vector<1x4x256xf32> to vector<4x256xf32>
    %c17_i32 = arith.constant 17 : i32
    %2 = tpu.dynamic_rotate %1 by %c17_i32 dim 1 : vector<4x256xf32>, i32 -> vector<4x256xf32>
    %c0_2 = arith.constant 0 : index
    %c0_3 = arith.constant 0 : index
    %3 = vector.load %arg6[%c0_2, %c0_3] : memref<18x256xf32, #tpu.memory_space<vmem>>, vector<1x256xf32>
    %4 = vector.broadcast %3 : vector<1x256xf32> to vector<4x256xf32>
    %5 = arith.mulf %2, %4 : vector<4x256xf32>
    %c0_4 = arith.constant 0 : index
    %c0_5 = arith.constant 0 : index
    %6 = vector.load %arg8[%c0_4, %c0_5] : memref<36x256xf32, #tpu.memory_space<vmem>>, vector<4x256xf32>
    tpu.vector_store %arg8[%c0_4, %c0_5], %5 {strides = array<i32>} : memref<36x256xf32, #tpu.memory_space<vmem>>, vector<4x256xf32>,
    %c16_i32 = arith.constant 16 : i32
    %7 = tpu.dynamic_rotate %1 by %c16_i32 dim 1 : vector<4x256xf32>, i32 -> vector<4x256xf32>
    %c1 = arith.constant 1 : index
    %c0_6 = arith.constant 0 : index
    %8 = vector.load %arg6[%c1, %c0_6] : memref<18x256xf32, #tpu.memory_space<vmem>>, vector<1x256xf32>
    %9 = vector.broadcast %8 : vector<1x256xf32> to vector<4x256xf32>
    %10 = arith.mulf %7, %9 : vector<4x256xf32>
    %c4 = arith.constant 4 : index
    %c0_7 = arith.constant 0 : index
    %11 = vector.load %arg8[%c4, %c0_7] : memref<36x256xf32, #tpu.memory_space<vmem>>, vector<4x256xf32>
    tpu.vector_store %arg8[%c4, %c0_7], %10 {strides = array<i32>} : memref<36x256xf32, #tpu.memory_space<vmem>>, vector<4x256xf32>,
    %c15_i32 = arith.constant 15 : i32
    %12 = tpu.dynamic_rotate %1 by %c15_i32 dim 1 : vector<4x256xf32>, i32 -> vector<4x256xf32>
    %c2 = arith.constant 2 : index
    %c0_8 = arith.constant 0 : index
    %13 = vector.load %arg6[%c2, %c0_8] : memref<18x256xf32, #tpu.memory_space<vmem>>, vector<1x256xf32>
    %14 = vector.broadcast %13 : vector<1x256xf32> to vector<4x256xf32>
    %15 = arith.mulf %12, %14 : vector<4x256xf32>
    %c8 = arith.constant 8 : index
    %c0_9 = arith.constant 0 : index
    %16 = vector.load %arg8[%c8, %c0_9] : memref<36x256xf32, #tpu.memory_space<vmem>>, vector<4x256xf32>
    tpu.vector_store %arg8[%c8, %c0_9], %15 {strides = array<i32>} : memref<36x256xf32, #tpu.memory_space<vmem>>, vector<4x256xf32>,
    %c1_i32 = arith.constant 1 : i32
    %17 = tpu.dynamic_rotate %1 by %c1_i32 dim 1 : vector<4x256xf32>, i32 -> vector<4x256xf32>
    %c3 = arith.constant 3 : index
    %c0_10 = arith.constant 0 : index
    %18 = vector.load %arg6[%c3, %c0_10] : memref<18x256xf32, #tpu.memory_space<vmem>>, vector<1x256xf32>
    %19 = vector.broadcast %18 : vector<1x256xf32> to vector<4x256xf32>
    %20 = arith.mulf %17, %19 : vector<4x256xf32>
    %c12 = arith.constant 12 : index
    %c0_11 = arith.constant 0 : index
    %21 = vector.load %arg8[%c12, %c0_11] : memref<36x256xf32, #tpu.memory_space<vmem>>, vector<4x256xf32>
    tpu.vector_store %arg8[%c12, %c0_11], %20 {strides = array<i32>} : memref<36x256xf32, #tpu.memory_space<vmem>>, vector<4x256xf32>,
    %c16 = arith.constant 16 : index
    %c0_12 = arith.constant 0 : index
    %22 = vector.load %arg8[%c16, %c0_12] : memref<36x256xf32, #tpu.memory_space<vmem>>, vector<4x256xf32>
    tpu.vector_store %arg8[%c16, %c0_12], %1 {strides = array<i32>} : memref<36x256xf32, #tpu.memory_space<vmem>>, vector<4x256xf32>,
    %c255_i32 = arith.constant 255 : i32
    %23 = tpu.dynamic_rotate %1 by %c255_i32 dim 1 : vector<4x256xf32>, i32 -> vector<4x256xf32>
    %c5 = arith.constant 5 : index
    %c0_13 = arith.constant 0 : index
    %24 = vector.load %arg6[%c5, %c0_13] : memref<18x256xf32, #tpu.memory_space<vmem>>, vector<1x256xf32>
    %25 = vector.broadcast %24 : vector<1x256xf32> to vector<4x256xf32>
    %26 = arith.mulf %23, %25 : vector<4x256xf32>
    %c20 = arith.constant 20 : index
    %c0_14 = arith.constant 0 : index
    %27 = vector.load %arg8[%c20, %c0_14] : memref<36x256xf32, #tpu.memory_space<vmem>>, vector<4x256xf32>
    tpu.vector_store %arg8[%c20, %c0_14], %26 {strides = array<i32>} : memref<36x256xf32, #tpu.memory_space<vmem>>, vector<4x256xf32>,
    %c241_i32 = arith.constant 241 : i32
    %28 = tpu.dynamic_rotate %1 by %c241_i32 dim 1 : vector<4x256xf32>, i32 -> vector<4x256xf32>
    %c6 = arith.constant 6 : index
    %c0_15 = arith.constant 0 : index
    %29 = vector.load %arg6[%c6, %c0_15] : memref<18x256xf32, #tpu.memory_space<vmem>>, vector<1x256xf32>
    %30 = vector.broadcast %29 : vector<1x256xf32> to vector<4x256xf32>
    %31 = arith.mulf %28, %30 : vector<4x256xf32>
    %c24 = arith.constant 24 : index
    %c0_16 = arith.constant 0 : index
    %32 = vector.load %arg8[%c24, %c0_16] : memref<36x256xf32, #tpu.memory_space<vmem>>, vector<4x256xf32>
    tpu.vector_store %arg8[%c24, %c0_16], %31 {strides = array<i32>} : memref<36x256xf32, #tpu.memory_space<vmem>>, vector<4x256xf32>,
    %c240_i32 = arith.constant 240 : i32
    %33 = tpu.dynamic_rotate %1 by %c240_i32 dim 1 : vector<4x256xf32>, i32 -> vector<4x256xf32>
    %c7 = arith.constant 7 : index
    %c0_17 = arith.constant 0 : index
    %34 = vector.load %arg6[%c7, %c0_17] : memref<18x256xf32, #tpu.memory_space<vmem>>, vector<1x256xf32>
    %35 = vector.broadcast %34 : vector<1x256xf32> to vector<4x256xf32>
    %36 = arith.mulf %33, %35 : vector<4x256xf32>
    %c28 = arith.constant 28 : index
    %c0_18 = arith.constant 0 : index
    %37 = vector.load %arg8[%c28, %c0_18] : memref<36x256xf32, #tpu.memory_space<vmem>>, vector<4x256xf32>
    tpu.vector_store %arg8[%c28, %c0_18], %36 {strides = array<i32>} : memref<36x256xf32, #tpu.memory_space<vmem>>, vector<4x256xf32>,
    %c239_i32 = arith.constant 239 : i32
    %38 = tpu.dynamic_rotate %1 by %c239_i32 dim 1 : vector<4x256xf32>, i32 -> vector<4x256xf32>
    %c8_19 = arith.constant 8 : index
    %c0_20 = arith.constant 0 : index
    %39 = vector.load %arg6[%c8_19, %c0_20] : memref<18x256xf32, #tpu.memory_space<vmem>>, vector<1x256xf32>
    %40 = vector.broadcast %39 : vector<1x256xf32> to vector<4x256xf32>
    %41 = arith.mulf %38, %40 : vector<4x256xf32>
    %c32 = arith.constant 32 : index
    %c0_21 = arith.constant 0 : index
    %42 = vector.load %arg8[%c32, %c0_21] : memref<36x256xf32, #tpu.memory_space<vmem>>, vector<4x256xf32>
    tpu.vector_store %arg8[%c32, %c0_21], %41 {strides = array<i32>} : memref<36x256xf32, #tpu.memory_space<vmem>>, vector<4x256xf32>,
    %c0_22 = arith.constant 0 : index
    %c0_23 = arith.constant 0 : index
    %43 = vector.load %arg2[%c0_22, %c0_23] : memref<4x36xf32, #tpu.memory_space<vmem>>, vector<4x36xf32>
    %c0_24 = arith.constant 0 : index
    %c0_25 = arith.constant 0 : index
    %44 = vector.load %arg8[%c0_24, %c0_25] : memref<36x256xf32, #tpu.memory_space<vmem>>, vector<36x256xf32>
    %cst = arith.constant dense<0.000000e+00> : vector<4x256xf32>
    %45 = tpu.matmul %43, %44, %cst {dimension_numbers = #tpu.dot_dimension_numbers<[1], [0], [0], [1], [0, 0, 1, 1], [], []>} : vector<4x36xf32>, vector<36x256xf32>, vector<4x256xf32> -> vector<4x256xf32>
    %c0_26 = arith.constant 0 : index
    %c0_27 = arith.constant 0 : index
    %46 = vector.load %arg5[%c0_26, %c0_27] : memref<4x8xf32, #tpu.memory_space<vmem>>, vector<4x1xf32>
    %c0_28 = arith.constant 0 : index
    %c1_29 = arith.constant 1 : index
    %47 = vector.load %arg5[%c0_28, %c1_29] : memref<4x8xf32, #tpu.memory_space<vmem>>, vector<4x1xf32>
    %cst_30 = arith.constant dense<0.000000e+00> : vector<4xf32>
    %48 = vector.multi_reduction <add>, %45, %cst_30 [1] : vector<4x256xf32> to vector<4xf32>
    %49 = vector.shape_cast %48 : vector<4xf32> to vector<4x1xf32>
    %50 = arith.mulf %45, %45 : vector<4x256xf32>
    %cst_31 = arith.constant dense<0.000000e+00> : vector<4xf32>
    %51 = vector.multi_reduction <add>, %50, %cst_31 [1] : vector<4x256xf32> to vector<4xf32>
    %52 = vector.shape_cast %51 : vector<4xf32> to vector<4x1xf32>
    %cst_32 = arith.constant 3.906250e-03 : f32
    %53 = vector.broadcast %cst_32 : f32 to vector<4x1xf32>
    %54 = arith.mulf %49, %53 : vector<4x1xf32>
    %cst_33 = arith.constant 3.906250e-03 : f32
    %55 = vector.broadcast %cst_33 : f32 to vector<4x1xf32>
    %56 = arith.mulf %52, %55 : vector<4x1xf32>
    %57 = arith.mulf %54, %54 : vector<4x1xf32>
    %58 = arith.subf %56, %57 : vector<4x1xf32>
    %cst_34 = arith.constant 0.000000e+00 : f32
    %59 = vector.broadcast %cst_34 : f32 to vector<4x1xf32>
    %60 = arith.maximumf %58, %59 : vector<4x1xf32>
    %cst_35 = arith.constant 9.99999974E-6 : f32
    %61 = vector.broadcast %cst_35 : f32 to vector<4x1xf32>
    %62 = arith.addf %60, %61 : vector<4x1xf32>
    %63 = math.rsqrt %62 : vector<4x1xf32>
    %64 = arith.mulf %46, %63 : vector<4x1xf32>
    %65 = arith.mulf %54, %64 : vector<4x1xf32>
    %66 = arith.subf %47, %65 : vector<4x1xf32>
    %67 = vector.broadcast %64 : vector<4x1xf32> to vector<4x256xf32>
    %68 = arith.mulf %45, %67 : vector<4x256xf32>
    %69 = vector.broadcast %66 : vector<4x1xf32> to vector<4x256xf32>
    %70 = arith.addf %68, %69 : vector<4x256xf32>
    %cst_36 = arith.constant 0.000000e+00 : f32
    %71 = vector.broadcast %cst_36 : f32 to vector<4x256xf32>
    %72 = arith.minimumf %70, %71 : vector<4x256xf32>
    %73 = math.exp %72 : vector<4x256xf32>
    %cst_37 = arith.constant 1.000000e+00 : f32
    %74 = vector.broadcast %cst_37 : f32 to vector<4x256xf32>
    %75 = arith.subf %73, %74 : vector<4x256xf32>
    %cst_38 = arith.constant 1.67326319 : f32
    %76 = vector.broadcast %cst_38 : f32 to vector<4x256xf32>
    %77 = arith.mulf %76, %75 : vector<4x256xf32>
    %cst_39 = arith.constant 0.000000e+00 : f32
    %78 = vector.broadcast %cst_39 : f32 to vector<4x256xf32>
    %79 = arith.cmpf ogt, %70, %78 : vector<4x256xf32>
    %80 = arith.select %79, %70, %77 : vector<4x256xi1>, vector<4x256xf32>
    %cst_40 = arith.constant 1.05070102 : f32
    %81 = vector.broadcast %cst_40 : f32 to vector<4x256xf32>
    %82 = arith.mulf %81, %80 : vector<4x256xf32>
    %c17_i32_41 = arith.constant 17 : i32
    %83 = tpu.dynamic_rotate %82 by %c17_i32_41 dim 1 : vector<4x256xf32>, i32 -> vector<4x256xf32>
    %c0_42 = arith.constant 0 : index
    %c0_43 = arith.constant 0 : index
    %84 = vector.load %arg6[%c0_42, %c0_43] : memref<18x256xf32, #tpu.memory_space<vmem>>, vector<1x256xf32>
    %85 = vector.broadcast %84 : vector<1x256xf32> to vector<4x256xf32>
    %86 = arith.mulf %83, %85 : vector<4x256xf32>
    %c0_44 = arith.constant 0 : index
    %c0_45 = arith.constant 0 : index
    %87 = vector.load %arg3[%c0_44, %c0_45] : memref<4x9xf32, #tpu.memory_space<vmem>>, vector<4x1xf32>
    %88 = vector.broadcast %87 : vector<4x1xf32> to vector<4x256xf32>
    %89 = arith.mulf %88, %86 : vector<4x256xf32>
    %c16_i32_46 = arith.constant 16 : i32
    %90 = tpu.dynamic_rotate %82 by %c16_i32_46 dim 1 : vector<4x256xf32>, i32 -> vector<4x256xf32>
    %c1_47 = arith.constant 1 : index
    %c0_48 = arith.constant 0 : index
    %91 = vector.load %arg6[%c1_47, %c0_48] : memref<18x256xf32, #tpu.memory_space<vmem>>, vector<1x256xf32>
    %92 = vector.broadcast %91 : vector<1x256xf32> to vector<4x256xf32>
    %93 = arith.mulf %90, %92 : vector<4x256xf32>
    %c0_49 = arith.constant 0 : index
    %c1_50 = arith.constant 1 : index
    %94 = vector.load %arg3[%c0_49, %c1_50] : memref<4x9xf32, #tpu.memory_space<vmem>>, vector<4x1xf32>
    %95 = vector.broadcast %94 : vector<4x1xf32> to vector<4x256xf32>
    %96 = arith.mulf %95, %93 : vector<4x256xf32>
    %c15_i32_51 = arith.constant 15 : i32
    %97 = tpu.dynamic_rotate %82 by %c15_i32_51 dim 1 : vector<4x256xf32>, i32 -> vector<4x256xf32>
    %c2_52 = arith.constant 2 : index
    %c0_53 = arith.constant 0 : index
    %98 = vector.load %arg6[%c2_52, %c0_53] : memref<18x256xf32, #tpu.memory_space<vmem>>, vector<1x256xf32>
    %99 = vector.broadcast %98 : vector<1x256xf32> to vector<4x256xf32>
    %100 = arith.mulf %97, %99 : vector<4x256xf32>
    %c0_54 = arith.constant 0 : index
    %c2_55 = arith.constant 2 : index
    %101 = vector.load %arg3[%c0_54, %c2_55] : memref<4x9xf32, #tpu.memory_space<vmem>>, vector<4x1xf32>
    %102 = vector.broadcast %101 : vector<4x1xf32> to vector<4x256xf32>
    %103 = arith.mulf %102, %100 : vector<4x256xf32>
    %c1_i32_56 = arith.constant 1 : i32
    %104 = tpu.dynamic_rotate %82 by %c1_i32_56 dim 1 : vector<4x256xf32>, i32 -> vector<4x256xf32>
    %c3_57 = arith.constant 3 : index
    %c0_58 = arith.constant 0 : index
    %105 = vector.load %arg6[%c3_57, %c0_58] : memref<18x256xf32, #tpu.memory_space<vmem>>, vector<1x256xf32>
    %106 = vector.broadcast %105 : vector<1x256xf32> to vector<4x256xf32>
    %107 = arith.mulf %104, %106 : vector<4x256xf32>
    %c0_59 = arith.constant 0 : index
    %c3_60 = arith.constant 3 : index
    %108 = vector.load %arg3[%c0_59, %c3_60] : memref<4x9xf32, #tpu.memory_space<vmem>>, vector<4x1xf32>
    %109 = vector.broadcast %108 : vector<4x1xf32> to vector<4x256xf32>
    %110 = arith.mulf %109, %107 : vector<4x256xf32>
    %111 = arith.addf %89, %110 : vector<4x256xf32>
    %c0_61 = arith.constant 0 : index
    %c4_62 = arith.constant 4 : index
    %112 = vector.load %arg3[%c0_61, %c4_62] : memref<4x9xf32, #tpu.memory_space<vmem>>, vector<4x1xf32>
    %113 = vector.broadcast %112 : vector<4x1xf32> to vector<4x256xf32>
    %114 = arith.mulf %113, %82 : vector<4x256xf32>
    %115 = arith.addf %96, %114 : vector<4x256xf32>
    %c255_i32_63 = arith.constant 255 : i32
    %116 = tpu.dynamic_rotate %82 by %c255_i32_63 dim 1 : vector<4x256xf32>, i32 -> vector<4x256xf32>
    %c5_64 = arith.constant 5 : index
    %c0_65 = arith.constant 0 : index
    %117 = vector.load %arg6[%c5_64, %c0_65] : memref<18x256xf32, #tpu.memory_space<vmem>>, vector<1x256xf32>
    %118 = vector.broadcast %117 : vector<1x256xf32> to vector<4x256xf32>
    %119 = arith.mulf %116, %118 : vector<4x256xf32>
    %c0_66 = arith.constant 0 : index
    %c5_67 = arith.constant 5 : index
    %120 = vector.load %arg3[%c0_66, %c5_67] : memref<4x9xf32, #tpu.memory_space<vmem>>, vector<4x1xf32>
    %121 = vector.broadcast %120 : vector<4x1xf32> to vector<4x256xf32>
    %122 = arith.mulf %121, %119 : vector<4x256xf32>
    %123 = arith.addf %103, %122 : vector<4x256xf32>
    %c241_i32_68 = arith.constant 241 : i32
    %124 = tpu.dynamic_rotate %82 by %c241_i32_68 dim 1 : vector<4x256xf32>, i32 -> vector<4x256xf32>
    %c6_69 = arith.constant 6 : index
    %c0_70 = arith.constant 0 : index
    %125 = vector.load %arg6[%c6_69, %c0_70] : memref<18x256xf32, #tpu.memory_space<vmem>>, vector<1x256xf32>
    %126 = vector.broadcast %125 : vector<1x256xf32> to vector<4x256xf32>
    %127 = arith.mulf %124, %126 : vector<4x256xf32>
    %c0_71 = arith.constant 0 : index
    %c6_72 = arith.constant 6 : index
    %128 = vector.load %arg3[%c0_71, %c6_72] : memref<4x9xf32, #tpu.memory_space<vmem>>, vector<4x1xf32>
    %129 = vector.broadcast %128 : vector<4x1xf32> to vector<4x256xf32>
    %130 = arith.mulf %129, %127 : vector<4x256xf32>
    %131 = arith.addf %111, %130 : vector<4x256xf32>
    %c240_i32_73 = arith.constant 240 : i32
    %132 = tpu.dynamic_rotate %82 by %c240_i32_73 dim 1 : vector<4x256xf32>, i32 -> vector<4x256xf32>
    %c7_74 = arith.constant 7 : index
    %c0_75 = arith.constant 0 : index
    %133 = vector.load %arg6[%c7_74, %c0_75] : memref<18x256xf32, #tpu.memory_space<vmem>>, vector<1x256xf32>
    %134 = vector.broadcast %133 : vector<1x256xf32> to vector<4x256xf32>
    %135 = arith.mulf %132, %134 : vector<4x256xf32>
    %c0_76 = arith.constant 0 : index
    %c7_77 = arith.constant 7 : index
    %136 = vector.load %arg3[%c0_76, %c7_77] : memref<4x9xf32, #tpu.memory_space<vmem>>, vector<4x1xf32>
    %137 = vector.broadcast %136 : vector<4x1xf32> to vector<4x256xf32>
    %138 = arith.mulf %137, %135 : vector<4x256xf32>
    %139 = arith.addf %115, %138 : vector<4x256xf32>
    %c239_i32_78 = arith.constant 239 : i32
    %140 = tpu.dynamic_rotate %82 by %c239_i32_78 dim 1 : vector<4x256xf32>, i32 -> vector<4x256xf32>
    %c8_79 = arith.constant 8 : index
    %c0_80 = arith.constant 0 : index
    %141 = vector.load %arg6[%c8_79, %c0_80] : memref<18x256xf32, #tpu.memory_space<vmem>>, vector<1x256xf32>
    %142 = vector.broadcast %141 : vector<1x256xf32> to vector<4x256xf32>
    %143 = arith.mulf %140, %142 : vector<4x256xf32>
    %c0_81 = arith.constant 0 : index
    %c8_82 = arith.constant 8 : index
    %144 = vector.load %arg3[%c0_81, %c8_82] : memref<4x9xf32, #tpu.memory_space<vmem>>, vector<4x1xf32>
    %145 = vector.broadcast %144 : vector<4x1xf32> to vector<4x256xf32>
    %146 = arith.mulf %145, %143 : vector<4x256xf32>
    %147 = arith.addf %123, %146 : vector<4x256xf32>
    %148 = arith.addf %131, %139 : vector<4x256xf32>
    %149 = arith.addf %148, %147 : vector<4x256xf32>
    %c0_83 = arith.constant 0 : index
    %c2_84 = arith.constant 2 : index
    %150 = vector.load %arg5[%c0_83, %c2_84] : memref<4x8xf32, #tpu.memory_space<vmem>>, vector<4x1xf32>
    %c0_85 = arith.constant 0 : index
    %c3_86 = arith.constant 3 : index
    %151 = vector.load %arg5[%c0_85, %c3_86] : memref<4x8xf32, #tpu.memory_space<vmem>>, vector<4x1xf32>
    %cst_87 = arith.constant dense<0.000000e+00> : vector<4xf32>
    %152 = vector.multi_reduction <add>, %149, %cst_87 [1] : vector<4x256xf32> to vector<4xf32>
    %153 = vector.shape_cast %152 : vector<4xf32> to vector<4x1xf32>
    %154 = arith.mulf %149, %149 : vector<4x256xf32>
    %cst_88 = arith.constant dense<0.000000e+00> : vector<4xf32>
    %155 = vector.multi_reduction <add>, %154, %cst_88 [1] : vector<4x256xf32> to vector<4xf32>
    %156 = vector.shape_cast %155 : vector<4xf32> to vector<4x1xf32>
    %cst_89 = arith.constant 3.906250e-03 : f32
    %157 = vector.broadcast %cst_89 : f32 to vector<4x1xf32>
    %158 = arith.mulf %153, %157 : vector<4x1xf32>
    %cst_90 = arith.constant 3.906250e-03 : f32
    %159 = vector.broadcast %cst_90 : f32 to vector<4x1xf32>
    %160 = arith.mulf %156, %159 : vector<4x1xf32>
    %161 = arith.mulf %158, %158 : vector<4x1xf32>
    %162 = arith.subf %160, %161 : vector<4x1xf32>
    %cst_91 = arith.constant 0.000000e+00 : f32
    %163 = vector.broadcast %cst_91 : f32 to vector<4x1xf32>
    %164 = arith.maximumf %162, %163 : vector<4x1xf32>
    %cst_92 = arith.constant 9.99999974E-6 : f32
    %165 = vector.broadcast %cst_92 : f32 to vector<4x1xf32>
    %166 = arith.addf %164, %165 : vector<4x1xf32>
    %167 = math.rsqrt %166 : vector<4x1xf32>
    %168 = arith.mulf %150, %167 : vector<4x1xf32>
    %169 = arith.mulf %158, %168 : vector<4x1xf32>
    %170 = arith.subf %151, %169 : vector<4x1xf32>
    %171 = vector.broadcast %168 : vector<4x1xf32> to vector<4x256xf32>
    %172 = arith.mulf %149, %171 : vector<4x256xf32>
    %173 = vector.broadcast %170 : vector<4x1xf32> to vector<4x256xf32>
    %174 = arith.addf %172, %173 : vector<4x256xf32>
    %cst_93 = arith.constant 0.000000e+00 : f32
    %175 = vector.broadcast %cst_93 : f32 to vector<4x256xf32>
    %176 = arith.minimumf %174, %175 : vector<4x256xf32>
    %177 = math.exp %176 : vector<4x256xf32>
    %cst_94 = arith.constant 1.000000e+00 : f32
    %178 = vector.broadcast %cst_94 : f32 to vector<4x256xf32>
    %179 = arith.subf %177, %178 : vector<4x256xf32>
    %cst_95 = arith.constant 1.67326319 : f32
    %180 = vector.broadcast %cst_95 : f32 to vector<4x256xf32>
    %181 = arith.mulf %180, %179 : vector<4x256xf32>
    %cst_96 = arith.constant 0.000000e+00 : f32
    %182 = vector.broadcast %cst_96 : f32 to vector<4x256xf32>
    %183 = arith.cmpf ogt, %174, %182 : vector<4x256xf32>
    %184 = arith.select %183, %174, %181 : vector<4x256xi1>, vector<4x256xf32>
    %cst_97 = arith.constant 1.05070102 : f32
    %185 = vector.broadcast %cst_97 : f32 to vector<4x256xf32>
    %186 = arith.mulf %185, %184 : vector<4x256xf32>
    %c17_i32_98 = arith.constant 17 : i32
    %187 = tpu.dynamic_rotate %82 by %c17_i32_98 dim 1 : vector<4x256xf32>, i32 -> vector<4x256xf32>
    %c9 = arith.constant 9 : index
    %c0_99 = arith.constant 0 : index
    %188 = vector.load %arg6[%c9, %c0_99] : memref<18x256xf32, #tpu.memory_space<vmem>>, vector<1x256xf32>
    %189 = vector.broadcast %188 : vector<1x256xf32> to vector<4x256xf32>
    %190 = arith.mulf %187, %189 : vector<4x256xf32>
    %c0_100 = arith.constant 0 : index
    %c0_101 = arith.constant 0 : index
    %191 = vector.load %arg4[%c0_100, %c0_101] : memref<4x9xf32, #tpu.memory_space<vmem>>, vector<4x1xf32>
    %192 = vector.broadcast %191 : vector<4x1xf32> to vector<4x256xf32>
    %193 = arith.mulf %192, %190 : vector<4x256xf32>
    %c16_i32_102 = arith.constant 16 : i32
    %194 = tpu.dynamic_rotate %82 by %c16_i32_102 dim 1 : vector<4x256xf32>, i32 -> vector<4x256xf32>
    %c10 = arith.constant 10 : index
    %c0_103 = arith.constant 0 : index
    %195 = vector.load %arg6[%c10, %c0_103] : memref<18x256xf32, #tpu.memory_space<vmem>>, vector<1x256xf32>
    %196 = vector.broadcast %195 : vector<1x256xf32> to vector<4x256xf32>
    %197 = arith.mulf %194, %196 : vector<4x256xf32>
    %c0_104 = arith.constant 0 : index
    %c1_105 = arith.constant 1 : index
    %198 = vector.load %arg4[%c0_104, %c1_105] : memref<4x9xf32, #tpu.memory_space<vmem>>, vector<4x1xf32>
    %199 = vector.broadcast %198 : vector<4x1xf32> to vector<4x256xf32>
    %200 = arith.mulf %199, %197 : vector<4x256xf32>
    %c15_i32_106 = arith.constant 15 : i32
    %201 = tpu.dynamic_rotate %82 by %c15_i32_106 dim 1 : vector<4x256xf32>, i32 -> vector<4x256xf32>
    %c11 = arith.constant 11 : index
    %c0_107 = arith.constant 0 : index
    %202 = vector.load %arg6[%c11, %c0_107] : memref<18x256xf32, #tpu.memory_space<vmem>>, vector<1x256xf32>
    %203 = vector.broadcast %202 : vector<1x256xf32> to vector<4x256xf32>
    %204 = arith.mulf %201, %203 : vector<4x256xf32>
    %c0_108 = arith.constant 0 : index
    %c2_109 = arith.constant 2 : index
    %205 = vector.load %arg4[%c0_108, %c2_109] : memref<4x9xf32, #tpu.memory_space<vmem>>, vector<4x1xf32>
    %206 = vector.broadcast %205 : vector<4x1xf32> to vector<4x256xf32>
    %207 = arith.mulf %206, %204 : vector<4x256xf32>
    %c1_i32_110 = arith.constant 1 : i32
    %208 = tpu.dynamic_rotate %82 by %c1_i32_110 dim 1 : vector<4x256xf32>, i32 -> vector<4x256xf32>
    %c12_111 = arith.constant 12 : index
    %c0_112 = arith.constant 0 : index
    %209 = vector.load %arg6[%c12_111, %c0_112] : memref<18x256xf32, #tpu.memory_space<vmem>>, vector<1x256xf32>
    %210 = vector.broadcast %209 : vector<1x256xf32> to vector<4x256xf32>
    %211 = arith.mulf %208, %210 : vector<4x256xf32>
    %c0_113 = arith.constant 0 : index
    %c3_114 = arith.constant 3 : index
    %212 = vector.load %arg4[%c0_113, %c3_114] : memref<4x9xf32, #tpu.memory_space<vmem>>, vector<4x1xf32>
    %213 = vector.broadcast %212 : vector<4x1xf32> to vector<4x256xf32>
    %214 = arith.mulf %213, %211 : vector<4x256xf32>
    %215 = arith.addf %193, %214 : vector<4x256xf32>
    %c0_115 = arith.constant 0 : index
    %c4_116 = arith.constant 4 : index
    %216 = vector.load %arg4[%c0_115, %c4_116] : memref<4x9xf32, #tpu.memory_space<vmem>>, vector<4x1xf32>
    %217 = vector.broadcast %216 : vector<4x1xf32> to vector<4x256xf32>
    %218 = arith.mulf %217, %82 : vector<4x256xf32>
    %219 = arith.addf %200, %218 : vector<4x256xf32>
    %c255_i32_117 = arith.constant 255 : i32
    %220 = tpu.dynamic_rotate %82 by %c255_i32_117 dim 1 : vector<4x256xf32>, i32 -> vector<4x256xf32>
    %c14 = arith.constant 14 : index
    %c0_118 = arith.constant 0 : index
    %221 = vector.load %arg6[%c14, %c0_118] : memref<18x256xf32, #tpu.memory_space<vmem>>, vector<1x256xf32>
    %222 = vector.broadcast %221 : vector<1x256xf32> to vector<4x256xf32>
    %223 = arith.mulf %220, %222 : vector<4x256xf32>
    %c0_119 = arith.constant 0 : index
    %c5_120 = arith.constant 5 : index
    %224 = vector.load %arg4[%c0_119, %c5_120] : memref<4x9xf32, #tpu.memory_space<vmem>>, vector<4x1xf32>
    %225 = vector.broadcast %224 : vector<4x1xf32> to vector<4x256xf32>
    %226 = arith.mulf %225, %223 : vector<4x256xf32>
    %227 = arith.addf %207, %226 : vector<4x256xf32>
    %c241_i32_121 = arith.constant 241 : i32
    %228 = tpu.dynamic_rotate %82 by %c241_i32_121 dim 1 : vector<4x256xf32>, i32 -> vector<4x256xf32>
    %c15 = arith.constant 15 : index
    %c0_122 = arith.constant 0 : index
    %229 = vector.load %arg6[%c15, %c0_122] : memref<18x256xf32, #tpu.memory_space<vmem>>, vector<1x256xf32>
    %230 = vector.broadcast %229 : vector<1x256xf32> to vector<4x256xf32>
    %231 = arith.mulf %228, %230 : vector<4x256xf32>
    %c0_123 = arith.constant 0 : index
    %c6_124 = arith.constant 6 : index
    %232 = vector.load %arg4[%c0_123, %c6_124] : memref<4x9xf32, #tpu.memory_space<vmem>>, vector<4x1xf32>
    %233 = vector.broadcast %232 : vector<4x1xf32> to vector<4x256xf32>
    %234 = arith.mulf %233, %231 : vector<4x256xf32>
    %235 = arith.addf %215, %234 : vector<4x256xf32>
    %c240_i32_125 = arith.constant 240 : i32
    %236 = tpu.dynamic_rotate %82 by %c240_i32_125 dim 1 : vector<4x256xf32>, i32 -> vector<4x256xf32>
    %c16_126 = arith.constant 16 : index
    %c0_127 = arith.constant 0 : index
    %237 = vector.load %arg6[%c16_126, %c0_127] : memref<18x256xf32, #tpu.memory_space<vmem>>, vector<1x256xf32>
    %238 = vector.broadcast %237 : vector<1x256xf32> to vector<4x256xf32>
    %239 = arith.mulf %236, %238 : vector<4x256xf32>
    %c0_128 = arith.constant 0 : index
    %c7_129 = arith.constant 7 : index
    %240 = vector.load %arg4[%c0_128, %c7_129] : memref<4x9xf32, #tpu.memory_space<vmem>>, vector<4x1xf32>
    %241 = vector.broadcast %240 : vector<4x1xf32> to vector<4x256xf32>
    %242 = arith.mulf %241, %239 : vector<4x256xf32>
    %243 = arith.addf %219, %242 : vector<4x256xf32>
    %c239_i32_130 = arith.constant 239 : i32
    %244 = tpu.dynamic_rotate %82 by %c239_i32_130 dim 1 : vector<4x256xf32>, i32 -> vector<4x256xf32>
    %c17 = arith.constant 17 : index
    %c0_131 = arith.constant 0 : index
    %245 = vector.load %arg6[%c17, %c0_131] : memref<18x256xf32, #tpu.memory_space<vmem>>, vector<1x256xf32>
    %246 = vector.broadcast %245 : vector<1x256xf32> to vector<4x256xf32>
    %247 = arith.mulf %244, %246 : vector<4x256xf32>
    %c0_132 = arith.constant 0 : index
    %c8_133 = arith.constant 8 : index
    %248 = vector.load %arg4[%c0_132, %c8_133] : memref<4x9xf32, #tpu.memory_space<vmem>>, vector<4x1xf32>
    %249 = vector.broadcast %248 : vector<4x1xf32> to vector<4x256xf32>
    %250 = arith.mulf %249, %247 : vector<4x256xf32>
    %251 = arith.addf %227, %250 : vector<4x256xf32>
    %252 = arith.addf %235, %243 : vector<4x256xf32>
    %253 = arith.addf %252, %251 : vector<4x256xf32>
    %c0_134 = arith.constant 0 : index
    %c4_135 = arith.constant 4 : index
    %254 = vector.load %arg5[%c0_134, %c4_135] : memref<4x8xf32, #tpu.memory_space<vmem>>, vector<4x1xf32>
    %c0_136 = arith.constant 0 : index
    %c5_137 = arith.constant 5 : index
    %255 = vector.load %arg5[%c0_136, %c5_137] : memref<4x8xf32, #tpu.memory_space<vmem>>, vector<4x1xf32>
    %cst_138 = arith.constant dense<0.000000e+00> : vector<4xf32>
    %256 = vector.multi_reduction <add>, %253, %cst_138 [1] : vector<4x256xf32> to vector<4xf32>
    %257 = vector.shape_cast %256 : vector<4xf32> to vector<4x1xf32>
    %258 = arith.mulf %253, %253 : vector<4x256xf32>
    %cst_139 = arith.constant dense<0.000000e+00> : vector<4xf32>
    %259 = vector.multi_reduction <add>, %258, %cst_139 [1] : vector<4x256xf32> to vector<4xf32>
    %260 = vector.shape_cast %259 : vector<4xf32> to vector<4x1xf32>
    %cst_140 = arith.constant 3.906250e-03 : f32
    %261 = vector.broadcast %cst_140 : f32 to vector<4x1xf32>
    %262 = arith.mulf %257, %261 : vector<4x1xf32>
    %cst_141 = arith.constant 3.906250e-03 : f32
    %263 = vector.broadcast %cst_141 : f32 to vector<4x1xf32>
    %264 = arith.mulf %260, %263 : vector<4x1xf32>
    %265 = arith.mulf %262, %262 : vector<4x1xf32>
    %266 = arith.subf %264, %265 : vector<4x1xf32>
    %cst_142 = arith.constant 0.000000e+00 : f32
    %267 = vector.broadcast %cst_142 : f32 to vector<4x1xf32>
    %268 = arith.maximumf %266, %267 : vector<4x1xf32>
    %cst_143 = arith.constant 9.99999974E-6 : f32
    %269 = vector.broadcast %cst_143 : f32 to vector<4x1xf32>
    %270 = arith.addf %268, %269 : vector<4x1xf32>
    %271 = math.rsqrt %270 : vector<4x1xf32>
    %272 = arith.mulf %254, %271 : vector<4x1xf32>
    %273 = arith.mulf %262, %272 : vector<4x1xf32>
    %274 = arith.subf %255, %273 : vector<4x1xf32>
    %275 = vector.broadcast %272 : vector<4x1xf32> to vector<4x256xf32>
    %276 = arith.mulf %253, %275 : vector<4x256xf32>
    %277 = vector.broadcast %274 : vector<4x1xf32> to vector<4x256xf32>
    %278 = arith.addf %276, %277 : vector<4x256xf32>
    %cst_144 = arith.constant 0.000000e+00 : f32
    %279 = vector.broadcast %cst_144 : f32 to vector<4x256xf32>
    %280 = arith.minimumf %278, %279 : vector<4x256xf32>
    %281 = math.exp %280 : vector<4x256xf32>
    %cst_145 = arith.constant 1.000000e+00 : f32
    %282 = vector.broadcast %cst_145 : f32 to vector<4x256xf32>
    %283 = arith.subf %281, %282 : vector<4x256xf32>
    %cst_146 = arith.constant 1.67326319 : f32
    %284 = vector.broadcast %cst_146 : f32 to vector<4x256xf32>
    %285 = arith.mulf %284, %283 : vector<4x256xf32>
    %cst_147 = arith.constant 0.000000e+00 : f32
    %286 = vector.broadcast %cst_147 : f32 to vector<4x256xf32>
    %287 = arith.cmpf ogt, %278, %286 : vector<4x256xf32>
    %288 = arith.select %287, %278, %285 : vector<4x256xi1>, vector<4x256xf32>
    %cst_148 = arith.constant 1.05070102 : f32
    %289 = vector.broadcast %cst_148 : f32 to vector<4x256xf32>
    %290 = arith.mulf %289, %288 : vector<4x256xf32>
    %291 = arith.addf %82, %186 : vector<4x256xf32>
    %292 = arith.addf %291, %290 : vector<4x256xf32>
    %c0_149 = arith.constant 0 : index
    %c6_150 = arith.constant 6 : index
    %293 = vector.load %arg5[%c0_149, %c6_150] : memref<4x8xf32, #tpu.memory_space<vmem>>, vector<4x1xf32>
    %c0_151 = arith.constant 0 : index
    %c7_152 = arith.constant 7 : index
    %294 = vector.load %arg5[%c0_151, %c7_152] : memref<4x8xf32, #tpu.memory_space<vmem>>, vector<4x1xf32>
    %cst_153 = arith.constant dense<0.000000e+00> : vector<4xf32>
    %295 = vector.multi_reduction <add>, %292, %cst_153 [1] : vector<4x256xf32> to vector<4xf32>
    %296 = vector.shape_cast %295 : vector<4xf32> to vector<4x1xf32>
    %297 = arith.mulf %292, %292 : vector<4x256xf32>
    %cst_154 = arith.constant dense<0.000000e+00> : vector<4xf32>
    %298 = vector.multi_reduction <add>, %297, %cst_154 [1] : vector<4x256xf32> to vector<4xf32>
    %299 = vector.shape_cast %298 : vector<4xf32> to vector<4x1xf32>
    %cst_155 = arith.constant 3.906250e-03 : f32
    %300 = vector.broadcast %cst_155 : f32 to vector<4x1xf32>
    %301 = arith.mulf %296, %300 : vector<4x1xf32>
    %cst_156 = arith.constant 3.906250e-03 : f32
    %302 = vector.broadcast %cst_156 : f32 to vector<4x1xf32>
    %303 = arith.mulf %299, %302 : vector<4x1xf32>
    %304 = arith.mulf %301, %301 : vector<4x1xf32>
    %305 = arith.subf %303, %304 : vector<4x1xf32>
    %cst_157 = arith.constant 0.000000e+00 : f32
    %306 = vector.broadcast %cst_157 : f32 to vector<4x1xf32>
    %307 = arith.maximumf %305, %306 : vector<4x1xf32>
    %cst_158 = arith.constant 9.99999974E-6 : f32
    %308 = vector.broadcast %cst_158 : f32 to vector<4x1xf32>
    %309 = arith.addf %307, %308 : vector<4x1xf32>
    %310 = math.rsqrt %309 : vector<4x1xf32>
    %311 = arith.mulf %293, %310 : vector<4x1xf32>
    %312 = arith.mulf %301, %311 : vector<4x1xf32>
    %313 = arith.subf %294, %312 : vector<4x1xf32>
    %314 = vector.broadcast %311 : vector<4x1xf32> to vector<4x256xf32>
    %315 = arith.mulf %292, %314 : vector<4x256xf32>
    %316 = vector.broadcast %313 : vector<4x1xf32> to vector<4x256xf32>
    %317 = arith.addf %315, %316 : vector<4x256xf32>
    %cst_159 = arith.constant 0.000000e+00 : f32
    %318 = vector.broadcast %cst_159 : f32 to vector<4x256xf32>
    %319 = arith.minimumf %317, %318 : vector<4x256xf32>
    %320 = math.exp %319 : vector<4x256xf32>
    %cst_160 = arith.constant 1.000000e+00 : f32
    %321 = vector.broadcast %cst_160 : f32 to vector<4x256xf32>
    %322 = arith.subf %320, %321 : vector<4x256xf32>
    %cst_161 = arith.constant 1.67326319 : f32
    %323 = vector.broadcast %cst_161 : f32 to vector<4x256xf32>
    %324 = arith.mulf %323, %322 : vector<4x256xf32>
    %cst_162 = arith.constant 0.000000e+00 : f32
    %325 = vector.broadcast %cst_162 : f32 to vector<4x256xf32>
    %326 = arith.cmpf ogt, %317, %325 : vector<4x256xf32>
    %327 = arith.select %326, %317, %324 : vector<4x256xi1>, vector<4x256xf32>
    %cst_163 = arith.constant 1.05070102 : f32
    %328 = vector.broadcast %cst_163 : f32 to vector<4x256xf32>
    %329 = arith.mulf %328, %327 : vector<4x256xf32>
    %c0_164 = arith.constant 0 : index
    %c0_165 = arith.constant 0 : index
    %c0_166 = arith.constant 0 : index
    %330 = vector.load %arg7[%c0_164, %c0_165, %c0_166] : memref<1x4x256xf32, #tpu.memory_space<vmem>>, vector<1x4x256xf32>
    %331 = vector.shape_cast %330 : vector<1x4x256xf32> to vector<4x256xf32>
    %332 = vector.shape_cast %329 : vector<4x256xf32> to vector<1x4x256xf32>
    tpu.vector_store %arg7[%c0_164, %c0_165, %c0_166], %332 {strides = array<i32>} : memref<1x4x256xf32, #tpu.memory_space<vmem>>, vector<1x4x256xf32>,
    return
  }
  func.func @transform_0(%arg0: i32) -> (i32, i32, i32) {
    %c0_i32 = arith.constant 0 : i32
    %c0_i32_0 = arith.constant 0 : i32
    %c0_i32_1 = arith.constant 0 : i32
    return %arg0, %c0_i32, %c0_i32_0 : i32, i32, i32
  }
  func.func @transform_1(%arg0: i32) -> (i32, i32) {
    %c0_i32 = arith.constant 0 : i32
    %c0_i32_0 = arith.constant 0 : i32
    %c0_i32_1 = arith.constant 0 : i32
    return %c0_i32, %c0_i32_0 : i32, i32
  }
  func.func @transform_2(%arg0: i32) -> (i32, i32) {
    %c0_i32 = arith.constant 0 : i32
    %c0_i32_0 = arith.constant 0 : i32
    %c0_i32_1 = arith.constant 0 : i32
    return %c0_i32, %c0_i32_0 : i32, i32
  }
  func.func @transform_3(%arg0: i32) -> (i32, i32) {
    %c0_i32 = arith.constant 0 : i32
    %c0_i32_0 = arith.constant 0 : i32
    %c0_i32_1 = arith.constant 0 : i32
    return %c0_i32, %c0_i32_0 : i32, i32
  }
  func.func @transform_4(%arg0: i32) -> (i32, i32) {
    %c0_i32 = arith.constant 0 : i32
    %c0_i32_0 = arith.constant 0 : i32
    %c0_i32_1 = arith.constant 0 : i32
    return %c0_i32, %c0_i32_0 : i32, i32
  }
  func.func @transform_5(%arg0: i32) -> (i32, i32) {
    %c0_i32 = arith.constant 0 : i32
    %c0_i32_0 = arith.constant 0 : i32
    %c0_i32_1 = arith.constant 0 : i32
    return %c0_i32, %c0_i32_0 : i32, i32
  }
  func.func @transform_6(%arg0: i32) -> (i32, i32, i32) {
    %c0_i32 = arith.constant 0 : i32
    %c0_i32_0 = arith.constant 0 : i32
    %c0_i32_1 = arith.constant 0 : i32
    return %arg0, %c0_i32, %c0_i32_0 : i32, i32, i32
  }
}

</mosaic_0001>

<bundles_post_ra>
// kernel: tca_forward.1
= control target key start
LH: loop header
LB: loop body
LE: loop exit
PB: predicated region body
PF: predicated region fallthrough
CT: control target
= control target key end

     0   :  { %s1464_s21 = smov 0   ;;  %s2029_s0 = inlined_call_operand.vmem [shape: f32[2,4,256], index: 0, kind: input, shape index: {}]   ;;  %s2030_s1 = inlined_call_operand.vmem [shape: f32[4,36], index: 1, kind: input, shape index: {}]   ;;  %s2031_s2 = inlined_call_operand.vmem [shape: f32[4,9], index: 2, kind: input, shape index: {}]   ;;  %s2032_s3 = inlined_call_operand.vmem [shape: f32[4,9], index: 3, kind: input, shape index: {}]   ;;  %s2033_s4 = inlined_call_operand.vmem [shape: f32[4,8], index: 4, kind: input, shape index: {}]   ;;  %s2034_s5 = inlined_call_operand.vmem [shape: f32[18,256], index: 5, kind: input, shape index: {}]   ;;  %s2035_s6 = inlined_call_operand.vmem [shape: f32[2,4,256], index: 6, kind: output, shape index: {}]  }
   0x1 LB: > { %s1281_s22 = sadd.s32 4294967295, %s1409_s21   ;;  %p1285_p0 = scmp.ge.s32.totalorder %s1409_s21, 1  ;;  %s1409_s21 = sphi %s1464_s21, %s16_s21  }
   0x2   : > { %p212_p1 = scmp.lt.s32.totalorder %s1409_s21, 3 }
   0x4   : > { %p213_p2 = pnand %p1285_p0, %p212_p1 }
   0x6   : > { %216 = sbr.rel (%p213_p2) target bundleno = 1854 (0x73e), region = 44 }
   0xb   : > { %p242_p3 = scmp.lt.s32.totalorder %s1281_s22, 1  ;;  %s1411_s27 = smov 111   ;;  %v1418_v2 = vmov 0.0   ;;  %v260_v3 = vlaneseq  ;;  %v1296_v8 = vld [vmem:[%s2034_s5 + $0x10] ss:$8 sm:$0x3] }
   0xc   : > { %s1412_s28 = smov 112   ;;  %s1413_s29 = smov 127   ;;  %561 = vmatprep.mubr.f32.mxu0 %v1418_v2  ;;  %v1293_v13 = vld [vmem:[%s2034_s5 + $0x5] ss:$8 sm:$0x3]  ;;  %vm490_vm4 = vcmask 1043456  }
   0xd   : > { %s2073_s22 = smov (!%p242_p3, %s1281_s22), 1  ;;  %s1414_s30 = smov 113   ;;  %v268_v4 = vshrl.u32 %v260_v3, 7  ;;  %v1496_v5 = vand.u32 127, %v260_v3  ;;  %vm486_vm9 = vcmask 293888  }
   0xe   : > { %s1325_s23 = sshll.u32 %s2073_s22, 3  ;;  %s1415_s7 = smov 1   ;;  %v1295_v14 = vld [vmem:[%s2034_s5 + $0x7] ss:$8 sm:$0x3] }
   0xf   : > { %s246_s26 = scalar_lea.vmem %s2029_s0, %s1325_s23  ;;  %s1416_s8 = smov 16   ;;  %v1498_v6 = vsub.s32 0, %v268_v4  ;;  %v1500_v7 = vsub.s32 1, %v268_v4  ;;  %vm455_vm0 = vcmp.lt.s32.totalorder %v1496_v5, 111  ;;  %vm371_vm1 = vcmp.lt.s32.totalorder %v1496_v5, 127 }
  0x10   : > { %v252_v0 = vld [vmem:[%s246_s26] sm:$0xff]  ;;  %s1417_s9 = smov 15   ;;  %s1419_s10 = smov 17   ;;  %vm425_vm2 = vcmp.lt.s32.totalorder %v1496_v5, 112  ;;  %vm401_vm3 = vcmp.lt.s32.totalorder %v1496_v5, 113  ;;  %vm339_vm5 = vcmp.lt.s32.totalorder %v1496_v5, 1 }
  0x11   : > { %451 = vrot.lane.b32.xlu1 %v252_v0, %s1411_s27  ;;  %365 = vst [vmem:[#allocation2 + $0x48] sm:$0xf] %v252_v0  ;;  %421 = vrot.lane.b32.xlu0 %v252_v0, %s1412_s28  ;;  %v254_v1 = vcombine.high %v252_v0, %v252_v0  ;;  %v464_v11 = vrot.slane %v1296_v8, %v1498_v6  ;;  %v1294_v21 = vld [vmem:[%s2034_s5 + $0x6] ss:$8 sm:$0x3]  ;;  %vm285_vm6 = vcmp.lt.s32.totalorder %v1496_v5, 16  ;;  %s251_s15 = scalar_lea.vmem %s2035_s6, %s1325_s23 }
  0x12   : > { %v468_v12 = vrot.slane %v1296_v8, %v1500_v7  ;;  %v380_v19 = vrot.slane %v1293_v13, %v1498_v6  ;;  %v384_v20 = vrot.slane %v1293_v13, %v1500_v7  ;;  %v434_v24 = vrot.slane %v1295_v14, %v1498_v6  ;;  %v1292_v38 = vld [vmem:[%s2034_s5 + $0x3] ss:$8 sm:$0x3]  ;;  %v1290_v51 = vld [vmem:[%s2034_s5 + $0x1] ss:$8 sm:$0x3] }
  0x13   : > { %366 = vst [vmem:[#allocation2 + $0x28] sm:$0xf] %v254_v1  ;;  %v438_v25 = vrot.slane %v1295_v14, %v1500_v7  ;;  %v410_v28 = vrot.slane %v1294_v21, %v1498_v6  ;;  %v414_v29 = vrot.slane %v1294_v21, %v1500_v7  ;;  %v348_v49 = vrot.slane %v1292_v38, %v1498_v6  ;;  %v1291_v62 = vld [vmem:[%s2034_s5 + $0x2] ss:$8 sm:$0x3] }
  0x14   : > { %v352_v50 = vrot.slane %v1292_v38, %v1500_v7  ;;  %v294_v60 = vrot.slane %v1290_v51, %v1498_v6  ;;  %v298_v61 = vrot.slane %v1290_v51, %v1500_v7  ;;  %vm315_vm7 = vcmp.lt.s32.totalorder %v1496_v5, 15  ;;  %v265_v14 = vld [vmem:[%s2034_s5] ss:$8 sm:$0x3] }
  0x15   : > { %367 = vrot.lane.b32.xlu0 %v252_v0, %s1413_s29  ;;  %453 = vrot.lane.b32.xlu1 %v254_v1, %s1411_s27  ;;  %vm262_vm8 = vcmp.lt.s32.totalorder %v1496_v5, 17 }
  0x19   : > { %369 = vrot.lane.b32.xlu1 %v254_v1, %s1413_s29  ;;  %423 = vrot.lane.b32.xlu0 %v254_v1, %s1412_s28 }
  0x1d   : > { %399 = vrot.lane.b32.xlu1 %v254_v1, %s1414_s30  ;;  %397 = vrot.lane.b32.xlu0 %v252_v0, %s1414_s30 }
  0x21   : > { %337 = vrot.lane.b32.xlu1 %v254_v1, %s1415_s7  ;;  %335 = vrot.lane.b32.xlu0 %v252_v0, %s1415_s7 }
  0x25   : > { %283 = vrot.lane.b32.xlu1 %v254_v1, %s1416_s8  ;;  %281 = vrot.lane.b32.xlu0 %v252_v0, %s1416_s8 }
  0x29   : > { %313 = vrot.lane.b32.xlu1 %v254_v1, %s1417_s9  ;;  %311 = vrot.lane.b32.xlu0 %v252_v0, %s1417_s9 }
  0x2d   : > { %258 = vrot.lane.b32.xlu1 %v254_v1, %s1419_s10  ;;  %256 = vrot.lane.b32.xlu0 %v252_v0, %s1419_s10 }
  0x83   : > { %v452_v9 = vpop.permute.xlu1 %451  ;;  %v422_v10 = vpop.permute.xlu0 %421 }
  0x87   : > { %v368_v15 = vpop.permute.xlu0 %367  ;;  %v454_v16 = vpop.permute.xlu1 %453 }
  0x88   : > { %v456_v17 = vsel %vm455_vm0, %v452_v9, %v454_v16  ;;  %v457_v18 = vsel %vm455_vm0, %v454_v16, %v452_v9 }
  0x89   : > { %v471_v22 = vmul.f32 %v464_v11, %v456_v17  ;;  %v472_v23 = vmul.f32 %v468_v12, %v457_v18  ;;  %v328_v11 = vrot.slane %v1291_v62, %v1500_v7 }
  0x8b   : > { %473 = vst [vmem:[#allocation2 + $0x40] sm:$0xf] %v471_v22  ;;  %474 = vst [vmem:[#allocation2 + $0x38] sm:$0xf] %v472_v23  ;;  %v370_v26 = vpop.permute.xlu1 %369  ;;  %v424_v27 = vpop.permute.xlu0 %423 }
  0x8c   : > { %v372_v30 = vsel %vm371_vm1, %v368_v15, %v370_v26  ;;  %v373_v31 = vsel %vm371_vm1, %v370_v26, %v368_v15  ;;  %v426_v32 = vsel %vm425_vm2, %v422_v10, %v424_v27  ;;  %v427_v33 = vsel %vm425_vm2, %v424_v27, %v422_v10 }
  0x8d   : > { %v387_v34 = vmul.f32 %v380_v19, %v372_v30  ;;  %v388_v35 = vmul.f32 %v384_v20, %v373_v31  ;;  %v441_v36 = vmul.f32 %v434_v24, %v426_v32  ;;  %v442_v37 = vmul.f32 %v438_v25, %v427_v33 }
  0x8e   : > { %v324_v10 = vrot.slane %v1291_v62, %v1498_v6  ;;  %v270_v25 = vrot.slane %v265_v14, %v1498_v6  ;;  %v274_v26 = vrot.slane %v265_v14, %v1500_v7  ;;  %v645_v62 = vld [vmem:[%s2031_s2] sm:$0xf] }
  0x8f   : > { %v391_v39 = vrot.slane %v387_v34, 4  ;;  %v392_v40 = vrot.slane %v388_v35, 4  ;;  %v445_v41 = vrot.slane %v441_v36, 4  ;;  %v446_v42 = vrot.slane %v442_v37, 4  ;;  %v400_v43 = vpop.permute.xlu1 %399  ;;  %v398_v44 = vpop.permute.xlu0 %397  ;;  %v475_v37 = vld [vmem:[%s2030_s1] sm:$0xf] }
  0x90   : > { %v402_v45 = vsel %vm401_vm3, %v398_v44, %v400_v43  ;;  %v403_v46 = vsel %vm401_vm3, %v400_v43, %v398_v44 }
  0x91   : > { %395 = vst [vmem:[#allocation2 + $0x48] sm:$0xf0] %v391_v39  ;;  %396 = vst [vmem:[#allocation2 + $0x28] sm:$0xf0] %v392_v40  ;;  %v417_v47 = vmul.f32 %v410_v28, %v402_v45  ;;  %v418_v48 = vmul.f32 %v414_v29, %v403_v46 }
  0x92   : > { %449 = vst [vmem:[#allocation2 + $0x8] sm:$0xf0] %v445_v41  ;;  %450 = vst [vmem:[#allocation2 + $0x20] sm:$0xf0] %v446_v42  ;;  %v485_v52 = vld [vmem:[#allocation2 + $0x38] sm:$0xf] }
  0x93   : > { %v484_v53 = vld [vmem:[#allocation2 + $0x40] sm:$0xf]  ;;  %419 = vst [vmem:[#allocation2 + $0x8] sm:$0xf] %v417_v47  ;;  %420 = vst [vmem:[#allocation2 + $0x20] sm:$0xf] %v418_v48  ;;  %1297 = vmatprep.subr.msk.mxu0 %vm490_vm4, %v485_v52  ;;  %v338_v54 = vpop.permute.xlu1 %337  ;;  %v336_v55 = vpop.permute.xlu0 %335 }
  0x94   : > { %v340_v56 = vsel %vm339_vm5, %v336_v55, %v338_v54  ;;  %v341_v57 = vsel %vm339_vm5, %v338_v54, %v336_v55  ;;  %1298 = vmatpush1.msk.msra.mxu0 %vm490_vm4, %v484_v53  ;;  %v1420_v48 = vmov 0  }
  0x95   : > { %v355_v58 = vmul.f32 %v348_v49, %v341_v57  ;;  %v356_v59 = vmul.f32 %v352_v50, %v340_v56  ;;  %1353 = vset.pattern.permute.xlu1 %v1420_v48  ;;  %v1421_v57 = vmov 1  }
  0x96   : > { %1354 = vset.pattern.permute.xlu0 %v1421_v57 }
  0x97   : > { %v359_v63 = vrot.slane %v355_v58, 4  ;;  %v360_v0 = vrot.slane %v356_v59, 4  ;;  %v284_v1 = vpop.permute.xlu1 %283  ;;  %v282_v2 = vpop.permute.xlu0 %281  ;;  %v1604_v58 = vld [vmem:[%s2033_s4] sm:$0xf] }
  0x98   : > { %v286_v3 = vsel %vm285_vm6, %v282_v2, %v284_v1  ;;  %v287_v4 = vsel %vm285_vm6, %v284_v1, %v282_v2  ;;  %v481_v21 = vld [vmem:[#allocation2 + $0x28] sm:$0xff]  ;;  %2047 = vst [vmem:[#allocation3_spill] sm:$0xff] %v1604_v58  ;;  %v2036_v1 = vmov 6   ;;  %v2038_v2 = vmov 7  }
  0x99   : > { %363 = vst [vmem:[#allocation2 + $0x18] sm:$0xf0] %v359_v63  ;;  %364 = vst [vmem:[#allocation2 + $0x10] sm:$0xf0] %v360_v0  ;;  %v301_v8 = vmul.f32 %v294_v60, %v287_v4  ;;  %v302_v9 = vmul.f32 %v298_v61, %v286_v3  ;;  %v480_v24 = vld [vmem:[#allocation2 + $0x48] sm:$0xff]  ;;  %v1422_v63 = vmov 4  }
  0x9a   : > { %v483_v12 = vld [vmem:[#allocation2 + $0x20] sm:$0xff]  ;;  %v482_v13 = vld [vmem:[#allocation2 + $0x8] sm:$0xff]  ;;  %v1423_v0 = vmov 2   ;;  %v2040_v4 = vmov 3  }
  0x9b   : > { %v305_v15 = vrot.slane %v301_v8, 4  ;;  %v306_v16 = vrot.slane %v302_v9, 4  ;;  %v314_v17 = vpop.permute.xlu1 %313  ;;  %521 = vmatprep.subr.mxu0 %v483_v12  ;;  %v312_v18 = vpop.permute.xlu0 %311  ;;  %v1617_v3 = vld [vmem:[%s2032_s3] sm:$0xf]  ;;  %v2037_v8 = vmov 5   ;;  %v1428_v9 = vmov 8  }
  0x9c   : > { %v316_v19 = vsel %vm315_vm7, %v312_v18, %v314_v17  ;;  %v317_v20 = vsel %vm315_vm7, %v314_v17, %v312_v18  ;;  %522 = vmatpush1.msra.mxu0 %v482_v13 }
  0x9d   : > { %309 = vst [vmem:[#allocation2 + $0x30] sm:$0xf0] %v305_v15  ;;  %310 = vst [vmem:[#allocation2] sm:$0xf0] %v306_v16  ;;  %v331_v22 = vmul.f32 %v324_v10, %v317_v20  ;;  %v332_v23 = vmul.f32 %v328_v11, %v316_v19  ;;  %523 = vmatprep.subr.mxu0 %v481_v21 }
  0x9e   : > { %524 = vmatpush1.msra.mxu0 %v480_v24 }
  0x9f   : > { %333 = vst [vmem:[#allocation2 + $0x18] sm:$0xf] %v331_v22  ;;  %334 = vst [vmem:[#allocation2 + $0x10] sm:$0xf] %v332_v23  ;;  %v259_v27 = vpop.permute.xlu1 %258  ;;  %v257_v28 = vpop.permute.xlu0 %256 }
  0xa0   : > { %v263_v29 = vsel %vm262_vm8, %v257_v28, %v259_v27  ;;  %v264_v30 = vsel %vm262_vm8, %v259_v27, %v257_v28 }
  0xa1   : > { %v277_v31 = vmul.f32 %v270_v25, %v264_v30  ;;  %v278_v32 = vmul.f32 %v274_v26, %v263_v29 }
  0xa3   : > { %279 = vst [vmem:[#allocation2 + $0x30] sm:$0xf] %v277_v31  ;;  %280 = vst [vmem:[#allocation2] sm:$0xf] %v278_v32 }
  0xa6   : > { %v479_v33 = vld [vmem:[#allocation2 + $0x10] sm:$0xff]  ;;  %v478_v34 = vld [vmem:[#allocation2 + $0x18] sm:$0xff] }
  0xa7   : > { %525 = vmatprep.subr.mxu0 %v479_v33 }
  0xa8   : > { %526 = vmatpush1.msra.mxu0 %v478_v34 }
  0xaa   : > { %v477_v35 = vld [vmem:[#allocation2] sm:$0xff]  ;;  %v476_v36 = vld [vmem:[#allocation2 + $0x30] sm:$0xff] }
  0xab   : > { %527 = vmatprep.subr.mxu0 %v477_v35 }
  0xac   : > { %528 = vmatpush1.msra.mxu0 %v476_v36 }
  0xad   : > { %1299 = vmatmul.mubr.msk.f32.vlgmr.msra.gmra.mxu0 %vm486_vm9, %v475_v37 }
 0x16d   : > { %v1587_v38 = vpop.f32.mrf.mxu0 }
 0x16e   : > { %v574_v39 = vmul.f32 %v1587_v38, %v1587_v38  ;;  %v569_v43 = vsel %vm490_vm4, %v1587_v38, 0.0 }
 0x16f   : > { %v1591_v40 = vpop.f32.mrf.mxu0 }
 0x170   : > { %v570_v41 = vsel %vm490_vm4, %v1591_v40, 0.0  ;;  %v575_v42 = vmul.f32 %v1591_v40, %v1591_v40  ;;  %v576_v45 = vsel %vm490_vm4, %v574_v39, 0.0 }
 0x171   : > { %v571_v44 = vadd.f32 %v570_v41, %v569_v43 }
 0x172   : > { %v577_v46 = vsel %vm490_vm4, %v575_v42, 0.0 }
 0x173   : > { %572 = vadd.xlane.f32.xlu0 %v571_v44  ;;  %v578_v47 = vadd.f32 %v577_v46, %v576_v45 }
 0x175   : > { %579 = vadd.xlane.f32.xlu1 %v578_v47 }
 0x1fc   : > { %v573_v49 = vpop.xlane.xlu0 %572 }
 0x1fd   : > { %v581_v50 = vmul.f32 0.00390625, %v573_v49 }
 0x1fe   : > { %v580_v51 = vpop.xlane.xlu1 %579 }
 0x1ff   : > { %v583_v52 = vmul.f32 %v581_v50, %v581_v50  ;;  %v582_v53 = vmul.f32 0.00390625, %v580_v51 }
 0x201   : > { %v584_v54 = vsub.f32 %v582_v53, %v583_v52  ;;  %v631_v53 = vld [vmem:[%s2034_s5] ss:$8 sm:$0x3] }
 0x203   : > { %v585_v55 = vmax.f32 %v584_v54, 0.0  ;;  %v1311_v54 = vld [vmem:[%s2034_s5 + $0x11] ss:$8 sm:$0x3] }
 0x205   : > { %v586_v56 = vadd.f32 1e-05, %v585_v55  ;;  %v1302_v55 = vld [vmem:[%s2034_s5 + $0x1] ss:$8 sm:$0x3] }
 0x207   : > { %1379 = vrsqrt.f32 %v586_v56  ;;  %v1312_v56 = vld [vmem:[%s2034_s5 + $0x12] ss:$8 sm:$0x3] }
 0x214   : > { %v1380_v59 = vpop.eup %1379 }
 0x215   : > { %v588_v60 = vmul.f32 %v1380_v59, %v1604_v58  ;;  %v1720_v59 = vld [vmem:[%s2034_s5 + $0x3] ss:$8 sm:$0x3] }
 0x217   : > { %597 = vperm.xlu1 %1353, %v588_v60   ;;  %v589_v61 = vmul.f32 %v588_v60, %v581_v50  ;;  %v1725_v60 = vld [vmem:[%s2034_s5 + $0x14] ss:$8 sm:$0x3] }
 0x219   : > { %591 = vrot.lane.b32.xlu0 %v589_v61, %s1415_s7  ;;  %v636_v61 = vrot.slane %v631_v53, %v1498_v6 }
 0x21b   : > { %648 = vperm.xlu1 %1353, %v645_v62  }
 0x21f   : > { %1355 = vset.pattern.permute.xlu1 %v1421_v57 }
 0x220   : > { %674 = vperm.xlu1 %1355, %v645_v62  }
 0x224   : > { %1357 = vset.pattern.permute.xlu1 %v1422_v63 }
 0x225   : > { %734 = vperm.xlu1 %1357, %v645_v62  }
 0x229   : > { %1358 = vset.pattern.permute.xlu1 %v1423_v0 }
 0x22a   : > { %700 = vperm.xlu1 %1358, %v645_v62  }
 0x22e   : > { %1360 = vset.pattern.permute.xlu1 %v2036_v1 }
 0x22f   : > { %790 = vperm.xlu1 %1360, %v645_v62  }
 0x233   : > { %1361 = vset.pattern.permute.xlu1 %v2038_v2 }
 0x234   : > { %818 = vperm.xlu1 %1361, %v645_v62  }
 0x238   : > { %1363 = vset.pattern.permute.xlu1 %v1421_v57 }
 0x239   : > { %952 = vperm.xlu1 %1363, %v1617_v3  }
 0x23d   : > { %1364 = vset.pattern.permute.xlu1 %v2040_v4 }
 0x23e   : > { %994 = vperm.xlu1 %1364, %v1617_v3  }
 0x242   : > { %1366 = vset.pattern.permute.xlu1 %v1423_v0 }
 0x243   : > { %973 = vperm.xlu1 %1366, %v1617_v3  }
 0x247   : > { %1367 = vset.pattern.permute.xlu1 %v2037_v8 }
 0x248   : > { %1025 = vperm.xlu1 %1367, %v1617_v3  }
 0x24c   : > { %1370 = vset.pattern.permute.xlu1 %v2038_v2  ;;  %v1817_v2 = vld [vmem:[%s2034_s5 + $0x20] ss:$8 sm:$0x3] }
 0x24d   : > { %1071 = vperm.xlu1 %1370, %v1617_v3  }
 0x251   : > { %1371 = vset.pattern.permute.xlu1 %v1428_v9 }
 0x28b   : > { %v592_v10 = vpop.permute.xlu0 %591 }
 0x28c   : > { %v594_v11 = vsub.f32 %v1604_v58, %v592_v10  ;;  %v668_v10 = vrot.slane %v1302_v55, %v1500_v7 }
 0x28e   : > { %604 = vperm.xlu0 %1354, %v594_v11   ;;  %v942_v11 = vrot.slane %v1312_v56, %v1498_v6 }
 0x292   : > { %1356 = vset.pattern.permute.xlu0 %v2040_v4  ;;  %v598_v12 = vpop.permute.xlu1 %597 }
 0x293   : > { %726 = vperm.xlu0 %1356, %v645_v62   ;;  %v600_v13 = vmul.f32 %v598_v12, %v1587_v38  ;;  %v601_v14 = vmul.f32 %v598_v12, %v1591_v40  ;;  %v1737_v12 = vld [vmem:[%s2034_s5 + $0x2] ss:$8 sm:$0x3] }
 0x296   : > { %v1675_v32 = vpop.permute.xlu1 %648 }
 0x297   : > { %1359 = vset.pattern.permute.xlu0 %v2037_v8 }
 0x298   : > { %762 = vperm.xlu0 %1359, %v645_v62  }
 0x29b   : > { %v1677_v33 = vpop.permute.xlu1 %674 }
 0x29c   : > { %1362 = vset.pattern.permute.xlu0 %v1420_v48 }
 0x29d   : > { %931 = vperm.xlu0 %1362, %v1617_v3  }
 0x2a0   : > { %v735_v34 = vpop.permute.xlu1 %734 }
 0x2a1   : > { %1365 = vset.pattern.permute.xlu0 %v1428_v9  ;;  %v664_v9 = vrot.slane %v1302_v55, %v1498_v6  ;;  %v1834_v55 = vld [vmem:[%s2034_s5 + $0x10] ss:$8 sm:$0x3] }
 0x2a2   : > { %846 = vperm.xlu0 %1365, %v645_v62   ;;  %v640_v62 = vrot.slane %v631_v53, %v1500_v7 }
 0x2a5   : > { %v1679_v35 = vpop.permute.xlu1 %700 }
 0x2a6   : > { %1368 = vset.pattern.permute.xlu0 %v2036_v1 }
 0x2a7   : > { %1048 = vperm.xlu0 %1368, %v1617_v3  }
 0x2aa   : > { %v1681_v36 = vpop.permute.xlu1 %790 }
 0x2ab   : > { %1369 = vset.pattern.permute.xlu0 %v1422_v63  ;;  %v919_v63 = vrot.slane %v1311_v54, %v1498_v6 }
 0x2ac   : > { %1002 = vperm.xlu0 %1369, %v1617_v3  }
 0x2af   : > { %v1683_v37 = vpop.permute.xlu1 %818 }
 0x2b4   : > { %v1687_v39 = vpop.permute.xlu1 %952 }
 0x2b9   : > { %v1691_v41 = vpop.permute.xlu1 %994 }
 0x2be   : > { %v1695_v43 = vpop.permute.xlu1 %973 }
 0x2c3   : > { %v1699_v45 = vpop.permute.xlu1 %1025 }
 0x2c4   : > { %2050 = vst [vmem:[#allocation6_spill] sm:$0xff] %v1699_v45 }
 0x2c8   : > { %v1703_v47 = vpop.permute.xlu1 %1071 }
 0x309   : > { %v605_v15 = vpop.permute.xlu0 %604 }
 0x30a   : > { %v607_v16 = vadd.f32 %v605_v15, %v600_v13  ;;  %v608_v17 = vadd.f32 %v605_v15, %v601_v14  ;;  %v1742_v13 = vld [vmem:[%s2034_s5 + $0x13] ss:$8 sm:$0x3]  ;;  %v946_v14 = vrot.slane %v1312_v56, %v1500_v7  ;;  %v716_v15 = vrot.slane %v1720_v59, %v1498_v6 }
 0x30c   : > { %v609_v18 = vmin.f32 %v607_v16, 0.0  ;;  %v610_v19 = vmin.f32 %v608_v17, 0.0  ;;  %vm619_vm10 = vcmp.gt.f32.partialorder %v607_v16, 0.0  ;;  %vm620_vm11 = vcmp.gt.f32.partialorder %v608_v17, 0.0 }
 0x30e   : > { %v611_v20 = vmul.f32 1.442695, %v609_v18  ;;  %v613_v21 = vmul.f32 1.442695, %v610_v19  ;;  %v1685_v38 = vpop.permute.xlu0 %726 }
 0x30f   : > { %v1754_v18 = vld [vmem:[%s2034_s5 + $0x5] ss:$8 sm:$0x3] }
 0x310   : > { %1381 = vpow2.f32 %v611_v20  ;;  %v752_v56 = vrot.slane %v1754_v18, %v1498_v6 }
 0x311   : > { %1383 = vpow2.f32 %v613_v21 }
 0x313   : > { %v1689_v40 = vpop.permute.xlu0 %762 }
 0x318   : > { %v1693_v42 = vpop.permute.xlu0 %931 }
 0x31d   : > { %v1382_v22 = vpop.eup %1381  ;;  %v1697_v44 = vpop.permute.xlu0 %846 }
 0x31e   : > { %v1384_v23 = vpop.eup %1383  ;;  %v1300_v24 = vadd.f32 -1.0, %v1382_v22 }
 0x31f   : > { %v1301_v25 = vadd.f32 -1.0, %v1384_v23 }
 0x320   : > { %v617_v26 = vmul.f32 1.6732632, %v1300_v24  ;;  %v1772_v24 = vld [vmem:[%s2034_s5 + $0x16] ss:$8 sm:$0x3] }
 0x321   : > { %v618_v27 = vmul.f32 1.6732632, %v1301_v25 }
 0x322   : > { %v621_v28 = vsel %vm619_vm10, %v607_v16, %v617_v26  ;;  %v1701_v46 = vpop.permute.xlu0 %1048  ;;  %v720_v16 = vrot.slane %v1720_v59, %v1500_v7  ;;  %v1804_v59 = vld [vmem:[%s2034_s5 + $0x7] ss:$8 sm:$0x3] }
 0x323   : > { %v622_v29 = vsel %vm620_vm11, %v608_v17, %v618_v27  ;;  %v1637_v30 = vmul.f32 1.050701, %v621_v28  ;;  %2051 = vst [vmem:[#allocation7_spill] sm:$0xff] %v1701_v46  ;;  %v808_v26 = vrot.slane %v1804_v59, %v1498_v6  ;;  %v836_v46 = vrot.slane %v1834_v55, %v1498_v6 }
 0x324   : > { %v1639_v31 = vmul.f32 1.050701, %v622_v29  ;;  %v1786_v29 = vld [vmem:[%s2034_s5 + $0x6] ss:$8 sm:$0x3] }
 0x325   : > { %2048 = vst [vmem:[#allocation4_spill] sm:$0xff] %v1637_v30  ;;  %625 = vrot.lane.b32.xlu1 %v1637_v30, %s1419_s10  ;;  %v1757_v19 = vmul.f32 %v735_v34, %v1637_v30  ;;  %v780_v28 = vrot.slane %v1786_v29, %v1498_v6 }
 0x326   : > { %2049 = vst [vmem:[#allocation5_spill] sm:$0xff] %v1639_v31  ;;  %627 = vrot.lane.b32.xlu0 %v1639_v31, %s1419_s10  ;;  %v1760_v20 = vmul.f32 %v735_v34, %v1639_v31  ;;  %v1791_v34 = vld [vmem:[%s2034_s5 + $0x17] ss:$8 sm:$0x3] }
 0x327   : > { %v1003_v48 = vpop.permute.xlu0 %1002 }
 0x328   : > { %v1763_v21 = vmul.f32 %v1003_v48, %v1637_v30  ;;  %v1775_v25 = vmul.f32 %v1003_v48, %v1639_v31 }
 0x329   : > { %653 = vrot.lane.b32.xlu1 %v1637_v30, %s1416_s8 }
 0x32a   : > { %655 = vrot.lane.b32.xlu0 %v1639_v31, %s1416_s8 }
 0x32d   : > { %707 = vrot.lane.b32.xlu1 %v1639_v31, %s1415_s7 }
 0x32e   : > { %705 = vrot.lane.b32.xlu0 %v1637_v30, %s1415_s7 }
 0x331   : > { %679 = vrot.lane.b32.xlu1 %v1637_v30, %s1417_s9 }
 0x332   : > { %741 = vrot.lane.b32.xlu0 %v1637_v30, %s1413_s29 }
 0x335   : > { %681 = vrot.lane.b32.xlu1 %v1639_v31, %s1417_s9 }
 0x336   : > { %769 = vrot.lane.b32.xlu0 %v1637_v30, %s1414_s30 }
 0x339   : > { %743 = vrot.lane.b32.xlu1 %v1639_v31, %s1413_s29 }
 0x33a   : > { %797 = vrot.lane.b32.xlu0 %v1637_v30, %s1412_s28 }
 0x33d   : > { %771 = vrot.lane.b32.xlu1 %v1639_v31, %s1414_s30 }
 0x33e   : > { %827 = vrot.lane.b32.xlu0 %v1639_v31, %s1411_s27 }
 0x341   : > { %799 = vrot.lane.b32.xlu1 %v1639_v31, %s1412_s28 }
 0x345   : > { %825 = vrot.lane.b32.xlu1 %v1637_v30, %s1411_s27 }
 0x349   : > { %1094 = vperm.xlu1 %1371, %v1617_v3   ;;  %v923_v3 = vrot.slane %v1311_v54, %v1500_v7 }
 0x34d   : > { %1372 = vset.pattern.permute.xlu1 %v1423_v0 }
 0x397   : > { %v626_v49 = vpop.permute.xlu1 %625 }
 0x398   : > { %v628_v50 = vpop.permute.xlu0 %627 }
 0x399   : > { %v629_v1 = vsel %vm262_vm8, %v626_v49, %v628_v50  ;;  %v630_v8 = vsel %vm262_vm8, %v628_v50, %v626_v49  ;;  %v784_v49 = vrot.slane %v1786_v29, %v1500_v7  ;;  %v812_v29 = vrot.slane %v1804_v59, %v1500_v7 }
 0x39a   : > { %v643_v22 = vmul.f32 %v636_v61, %v630_v8  ;;  %v644_v17 = vmul.f32 %v640_v62, %v629_v1  ;;  %v926_v27 = vmul.f32 %v919_v63, %v630_v8  ;;  %v927_v50 = vmul.f32 %v923_v3, %v629_v1 }
 0x39b   : > { %v654_v51 = vpop.permute.xlu1 %653  ;;  %v840_v8 = vrot.slane %v1834_v55, %v1500_v7 }
 0x39c   : > { %v656_v52 = vpop.permute.xlu0 %655 }
 0x39d   : > { %v657_v48 = vsel %vm285_vm6, %v654_v51, %v656_v52  ;;  %v658_v53 = vsel %vm285_vm6, %v656_v52, %v654_v51  ;;  %v756_v51 = vrot.slane %v1754_v18, %v1500_v7 }
 0x39e   : > { %v671_v18 = vmul.f32 %v664_v9, %v658_v53  ;;  %v672_v52 = vmul.f32 %v668_v10, %v657_v48  ;;  %v1843_v10 = vld [vmem:[%s2034_s5 + $0x21] ss:$8 sm:$0x3]  ;;  %v949_v31 = vmul.f32 %v942_v11, %v658_v53  ;;  %v950_v58 = vmul.f32 %v946_v14, %v657_v48 }
 0x39f   : > { %v708_v57 = vpop.permute.xlu1 %707  ;;  %v1065_v9 = vrot.slane %v1817_v2, %v1500_v7  ;;  %v1084_v63 = vrot.slane %v1843_v10, %v1498_v6  ;;  %v1088_v11 = vrot.slane %v1843_v10, %v1500_v7  ;;  %v1864_v14 = vmul.f32 %v1693_v42, %v926_v27 }
 0x3a0   : > { %v706_v0 = vpop.permute.xlu0 %705  ;;  %v677_v45 = vmul.f32 %v1677_v33, %v671_v18  ;;  %v678_v1 = vmul.f32 %v1677_v33, %v672_v52  ;;  %v1867_v48 = vmul.f32 %v1693_v42, %v927_v50  ;;  %v955_v33 = vmul.f32 %v1687_v39, %v949_v31 }
 0x3a1   : > { %v710_v30 = vsel %vm339_vm5, %v708_v57, %v706_v0  ;;  %v709_v61 = vsel %vm339_vm5, %v706_v0, %v708_v57  ;;  %v651_v57 = vmul.f32 %v1675_v32, %v643_v22  ;;  %v652_v0 = vmul.f32 %v1675_v32, %v644_v17 }
 0x3a2   : > { %v723_v3 = vmul.f32 %v716_v15, %v710_v30  ;;  %v724_v53 = vmul.f32 %v720_v16, %v709_v61  ;;  %v956_v55 = vmul.f32 %v1687_v39, %v950_v58  ;;  %v2052_v22 = vrot.slane %v1725_v60, %v1498_v6 }
 0x3a3   : > { %v1767_v23 = vpop.permute.xlu1 %679  ;;  %v739_v27 = vadd.f32 %v1757_v19, %v677_v45  ;;  %v740_v42 = vadd.f32 %v1760_v20, %v678_v1  ;;  %v1895_v20 = vadd.f32 %v1763_v21, %v955_v33  ;;  %v2055_v21 = vrot.slane %v1737_v12, %v1500_v7 }
 0x3a4   : > { %v742_v54 = vpop.permute.xlu0 %741  ;;  %v991_v52 = vmul.f32 %v2052_v22, %v710_v30  ;;  %v729_v39 = vmul.f32 %v1685_v38, %v723_v3  ;;  %v2053_v30 = vrot.slane %v1725_v60, %v1500_v7  ;;  %v730_v50 = vmul.f32 %v1685_v38, %v724_v53 }
 0x3a5   : > { %v2054_v22 = vrot.slane %v1737_v12, %v1498_v6  ;;  %v2056_v53 = vrot.slane %v1742_v13, %v1498_v6 }
 0x3a6   : > { %v992_v16 = vmul.f32 %v2053_v30, %v709_v61  ;;  %v997_v60 = vmul.f32 %v1691_v41, %v991_v52  ;;  %v732_v33 = vadd.f32 %v730_v50, %v652_v0 }
 0x3a7   : > { %v682_v4 = vpop.permute.xlu1 %681 }
 0x3a8   : > { %v770_v62 = vpop.permute.xlu0 %769  ;;  %v684_v45 = vsel %vm315_vm7, %v682_v4, %v1767_v23 }
 0x3ab   : > { %v744_v59 = vpop.permute.xlu1 %743 }
 0x3ac   : > { %v745_v32 = vsel %vm371_vm1, %v742_v54, %v744_v59  ;;  %v746_v15 = vsel %vm371_vm1, %v744_v59, %v742_v54  ;;  %v683_v54 = vsel %vm315_vm7, %v1767_v23, %v682_v4  ;;  %v798_v19 = vpop.permute.xlu0 %797  ;;  %v1899_v59 = vadd.f32 %v1775_v25, %v956_v55 }
 0x3ad   : > { %v759_v18 = vmul.f32 %v752_v56, %v745_v32  ;;  %v697_v4 = vmul.f32 %v2054_v22, %v684_v45  ;;  %v698_v23 = vmul.f32 %v2055_v21, %v683_v54  ;;  %v731_v56 = vadd.f32 %v729_v39, %v651_v57 }
 0x3ae   : > { %v970_v55 = vmul.f32 %v2056_v53, %v684_v45 }
 0x3af   : > { %v772_v17 = vpop.permute.xlu1 %771  ;;  %v765_v52 = vmul.f32 %v1689_v40, %v759_v18  ;;  %v704_v0 = vmul.f32 %v1679_v35, %v698_v23 }
 0x3b0   : > { %v773_v31 = vsel %vm401_vm3, %v770_v62, %v772_v17  ;;  %v774_v58 = vsel %vm401_vm3, %v772_v17, %v770_v62  ;;  %v760_v62 = vmul.f32 %v756_v51, %v746_v15  ;;  %v998_v51 = vmul.f32 %v1691_v41, %v992_v16  ;;  %v828_v22 = vpop.permute.xlu0 %827 }
 0x3b1   : > { %v787_v61 = vmul.f32 %v780_v28, %v773_v31  ;;  %v788_v1 = vmul.f32 %v784_v49, %v774_v58 }
 0x3b2   : > { %v766_v12 = vmul.f32 %v1689_v40, %v760_v62 }
 0x3b3   : > { %v800_v3 = vpop.permute.xlu1 %799  ;;  %v793_v17 = vmul.f32 %v1681_v36, %v787_v61  ;;  %v794_v30 = vmul.f32 %v1681_v36, %v788_v1 }
 0x3b4   : > { %v801_v38 = vsel %vm425_vm2, %v798_v19, %v800_v3  ;;  %v802_v25 = vsel %vm425_vm2, %v800_v3, %v798_v19  ;;  %v768_v18 = vadd.f32 %v766_v12, %v704_v0 }
 0x3b5   : > { %v815_v28 = vmul.f32 %v808_v26, %v801_v38  ;;  %v816_v49 = vmul.f32 %v812_v29, %v802_v25  ;;  %v703_v29 = vmul.f32 %v1679_v35, %v697_v4  ;;  %v1069_v35 = vmul.f32 %v1065_v9, %v802_v25 }
 0x3b6   : > { %v795_v61 = vadd.f32 %v793_v17, %v731_v56  ;;  %v796_v1 = vadd.f32 %v794_v30, %v732_v33  ;;  %v2060_v4 = vrot.slane %v1791_v34, %v1498_v6  ;;  %v999_v56 = vadd.f32 %v997_v60, %v1864_v14  ;;  %v2063_v33 = vld [vmem:[#allocation6_spill] sm:$0xff]  ;;  %v2064_v60 = vld [vmem:[#allocation7_spill] sm:$0xff] }
 0x3b7   : > { %v821_v57 = vmul.f32 %v1683_v37, %v815_v28  ;;  %v822_v41 = vmul.f32 %v1683_v37, %v816_v49  ;;  %v826_v26 = vpop.permute.xlu1 %825  ;;  %v767_v50 = vadd.f32 %v765_v52, %v703_v29  ;;  %v2057_v37 = vrot.slane %v1817_v2, %v1498_v6 }
 0x3b8   : > { %v829_v39 = vsel %vm455_vm0, %v826_v26, %v828_v22  ;;  %v830_v40 = vsel %vm455_vm0, %v828_v22, %v826_v26  ;;  %v1045_v21 = vmul.f32 %v2060_v4, %v773_v31  ;;  %v2061_v2 = vrot.slane %v1791_v34, %v1500_v7 }
 0x3b9   : > { %v823_v16 = vadd.f32 %v821_v57, %v739_v27  ;;  %v824_v45 = vadd.f32 %v822_v41, %v740_v42  ;;  %v843_v19 = vmul.f32 %v836_v46, %v829_v39  ;;  %v844_v36 = vmul.f32 %v840_v8, %v830_v40 }
 0x3ba   : > { %v1068_v62 = vmul.f32 %v2057_v37, %v801_v38  ;;  %v2058_v46 = vrot.slane %v1772_v24, %v1498_v6  ;;  %v2059_v27 = vrot.slane %v1772_v24, %v1500_v7  ;;  %v1046_v9 = vmul.f32 %v2061_v2, %v774_v58 }
 0x3bb   : > { %v849_v3 = vmul.f32 %v1697_v44, %v843_v19  ;;  %v850_v5 = vmul.f32 %v1697_v44, %v844_v36  ;;  %v853_v23 = vadd.f32 %v823_v16, %v795_v61  ;;  %v854_v38 = vadd.f32 %v824_v45, %v796_v1 }
 0x3bc   : > { %v1022_v8 = vmul.f32 %v2058_v46, %v745_v32  ;;  %v1023_v42 = vmul.f32 %v2059_v27, %v746_v15  ;;  %v2062_v32 = vrot.slane %v1742_v13, %v1500_v7  ;;  %v1074_v24 = vmul.f32 %v1703_v47, %v1068_v62 }
 0x3bd   : > { %v851_v25 = vadd.f32 %v849_v3, %v767_v50  ;;  %v852_v44 = vadd.f32 %v850_v5, %v768_v18  ;;  %v1075_v15 = vmul.f32 %v1703_v47, %v1069_v35  ;;  %v1000_v31 = vadd.f32 %v998_v51, %v1867_v48 }
 0x3be   : > { %v971_v28 = vmul.f32 %v2062_v32, %v683_v54  ;;  %v976_v49 = vmul.f32 %v1695_v43, %v970_v55  ;;  %v1028_v53 = vmul.f32 %v2063_v33, %v1022_v8  ;;  %v1029_v14 = vmul.f32 %v2063_v33, %v1023_v42 }
 0x3bf   : > { %v1956_v34 = vadd.f32 %v853_v23, %v851_v25  ;;  %v1958_v58 = vadd.f32 %v854_v38, %v852_v44  ;;  %v1051_v52 = vmul.f32 %v2064_v60, %v1045_v21  ;;  %v1052_v13 = vmul.f32 %v2064_v60, %v1046_v9 }
 0x3c0   : > { %v977_v55 = vmul.f32 %v1695_v43, %v971_v28  ;;  %v1076_v12 = vadd.f32 %v1074_v24, %v1895_v20  ;;  %v1077_v17 = vadd.f32 %v1075_v15, %v1899_v59  ;;  %v1091_v22 = vmul.f32 %v1084_v63, %v829_v39  ;;  %v2065_v28 = vld [vmem:[#allocation3_spill] sm:$0xff] }
 0x3c1   : > { %v857_v54 = vsel %vm490_vm4, %v1956_v34, 0.0  ;;  %v858_v47 = vsel %vm490_vm4, %v1958_v58, 0.0  ;;  %v862_v48 = vmul.f32 %v1956_v34, %v1956_v34  ;;  %v863_v51 = vmul.f32 %v1958_v58, %v1958_v58 }
 0x3c2   : > { %v859_v30 = vadd.f32 %v858_v47, %v857_v54  ;;  %v1092_v57 = vmul.f32 %v1088_v11, %v830_v40  ;;  %v1030_v0 = vadd.f32 %v1028_v53, %v976_v49  ;;  %v1031_v43 = vadd.f32 %v1029_v14, %v977_v55 }
 0x3c3   : > { %v864_v41 = vsel %vm490_vm4, %v862_v48, 0.0  ;;  %v865_v26 = vsel %vm490_vm4, %v863_v51, 0.0  ;;  %v1053_v16 = vadd.f32 %v1051_v52, %v999_v56  ;;  %v1054_v59 = vadd.f32 %v1052_v13, %v1000_v31 }
 0x3c4   : > { %v1095_v29 = vpop.permute.xlu1 %1094  ;;  %860 = vadd.xlane.f32.xlu0 %v859_v30  ;;  %v866_v20 = vadd.f32 %v865_v26, %v864_v41  ;;  %v2066_v33 = vmov 3   ;;  %v2067_v14 = vmov 7   ;;  %v2068_v13 = vmov 5  }
 0x3c5   : > { %v1097_v45 = vmul.f32 %v1095_v29, %v1091_v22  ;;  %v1098_v19 = vmul.f32 %v1095_v29, %v1092_v57  ;;  %v1101_v39 = vadd.f32 %v1076_v12, %v1053_v16  ;;  %v1102_v36 = vadd.f32 %v1077_v17, %v1054_v59 }
 0x3c6   : > { %867 = vadd.xlane.f32.xlu1 %v866_v20  ;;  %v2069_v48 = vmov 6  }
 0x3c7   : > { %v1099_v6 = vadd.f32 %v1097_v45, %v1030_v0  ;;  %v1100_v63 = vadd.f32 %v1098_v19, %v1031_v43 }
 0x3c9   : > { %v1983_v7 = vadd.f32 %v1101_v39, %v1099_v6  ;;  %v1985_v10 = vadd.f32 %v1102_v36, %v1100_v63 }
 0x3cb   : > { %v1105_v11 = vsel %vm490_vm4, %v1983_v7, 0.0  ;;  %v1106_v40 = vsel %vm490_vm4, %v1985_v10, 0.0  ;;  %v1110_v50 = vmul.f32 %v1983_v7, %v1983_v7  ;;  %v1111_v18 = vmul.f32 %v1985_v10, %v1985_v10 }
 0x3cc   : > { %v1107_v37 = vadd.f32 %v1106_v40, %v1105_v11 }
 0x3cd   : > { %v1112_v62 = vsel %vm490_vm4, %v1110_v50, 0.0  ;;  %v1113_v35 = vsel %vm490_vm4, %v1111_v18, 0.0 }
 0x3ce   : > { %1108 = vadd.xlane.f32.xlu0 %v1107_v37  ;;  %v1114_v61 = vadd.f32 %v1113_v35, %v1112_v62 }
 0x3d2   : > { %1115 = vadd.xlane.f32.xlu0 %v1114_v61 }
 0x44d   : > { %v861_v1 = vpop.xlane.xlu0 %860 }
 0x44e   : > { %v869_v3 = vmul.f32 0.00390625, %v861_v1 }
 0x44f   : > { %v868_v5 = vpop.xlane.xlu1 %867 }
 0x450   : > { %v871_v46 = vmul.f32 %v869_v3, %v869_v3  ;;  %v870_v8 = vmul.f32 0.00390625, %v868_v5 }
 0x452   : > { %v872_v27 = vsub.f32 %v870_v8, %v871_v46  ;;  %v2070_v8 = vld [vmem:[#allocation4_spill] sm:$0xff] }
 0x454   : > { %v873_v42 = vmax.f32 %v872_v27, 0.0 }
 0x456   : > { %v874_v4 = vadd.f32 1e-05, %v873_v42 }
 0x457   : > { %v1109_v21 = vpop.xlane.xlu0 %1108 }
 0x458   : > { %1385 = vrsqrt.f32 %v874_v4  ;;  %v1117_v2 = vmul.f32 0.00390625, %v1109_v21  ;;  %v2071_v21 = vld [vmem:[#allocation5_spill] sm:$0xff] }
 0x45a   : > { %v1119_v23 = vmul.f32 %v1117_v2, %v1117_v2 }
 0x45b   : > { %v1116_v9 = vpop.xlane.xlu0 %1115 }
 0x45c   : > { %v1118_v38 = vmul.f32 0.00390625, %v1116_v9 }
 0x45e   : > { %v1120_v25 = vsub.f32 %v1118_v38, %v1119_v23 }
 0x460   : > { %v1121_v44 = vmax.f32 %v1120_v25, 0.0 }
 0x462   : > { %v1122_v56 = vadd.f32 1e-05, %v1121_v44 }
 0x464   : > { %1387 = vrsqrt.f32 %v1122_v56 }
 0x465   : > { %v1386_v32 = vpop.eup %1385 }
 0x466   : > { %v876_v24 = vmul.f32 %v1386_v32, %v2065_v28 }
 0x468   : > { %v877_v15 = vmul.f32 %v876_v24, %v869_v3 }
 0x46a   : > { %879 = vrot.lane.b32.xlu1 %v877_v15, %s1415_s7 }
 0x46e   : > { %885 = vperm.xlu1 %1372, %v876_v24  }
 0x471   : > { %v1388_v31 = vpop.eup %1387 }
 0x472   : > { %v1124_v49 = vmul.f32 %v1388_v31, %v2065_v28  ;;  %1373 = vset.pattern.permute.xlu1 %v2066_v33 }
 0x474   : > { %v1125_v53 = vmul.f32 %v1124_v49, %v1117_v2 }
 0x476   : > { %1127 = vrot.lane.b32.xlu0 %v1125_v53, %s1415_s7 }
 0x47a   : > { %1133 = vperm.xlu0 %1369, %v1124_v49  }
 0x47e   : > { %1377 = vset.pattern.permute.xlu0 %v2067_v14 }
 0x4dc   : > { %v880_v60 = vpop.permute.xlu1 %879 }
 0x4dd   : > { %v882_v52 = vsub.f32 %v2065_v28, %v880_v60 }
 0x4df   : > { %892 = vperm.xlu1 %1373, %v882_v52  }
 0x4e3   : > { %1374 = vset.pattern.permute.xlu1 %v2068_v13 }
 0x4e8   : > { %v1128_v54 = vpop.permute.xlu0 %1127 }
 0x4e9   : > { %v1130_v47 = vsub.f32 %v2065_v28, %v1128_v54  ;;  %v886_v51 = vpop.permute.xlu1 %885 }
 0x4ea   : > { %v888_v55 = vmul.f32 %v886_v51, %v1956_v34  ;;  %v889_v12 = vmul.f32 %v886_v51, %v1958_v58 }
 0x4eb   : > { %1140 = vperm.xlu1 %1374, %v1130_v47  }
 0x4ef   : > { %1375 = vset.pattern.permute.xlu1 %v2069_v48 }
 0x4f5   : > { %v1134_v0 = vpop.permute.xlu0 %1133 }
 0x4f6   : > { %v1136_v43 = vmul.f32 %v1134_v0, %v1983_v7  ;;  %v1137_v20 = vmul.f32 %v1134_v0, %v1985_v10 }
 0x55a   : > { %v893_v17 = vpop.permute.xlu1 %892 }
 0x55b   : > { %v895_v30 = vadd.f32 %v893_v17, %v888_v55  ;;  %v896_v22 = vadd.f32 %v893_v17, %v889_v12 }
 0x55d   : > { %v897_v57 = vmin.f32 %v895_v30, 0.0  ;;  %v898_v41 = vmin.f32 %v896_v22, 0.0  ;;  %vm907_vm12 = vcmp.gt.f32.partialorder %v895_v30, 0.0  ;;  %vm908_vm13 = vcmp.gt.f32.partialorder %v896_v22, 0.0 }
 0x55f   : > { %v899_v26 = vmul.f32 1.442695, %v897_v57  ;;  %v901_v29 = vmul.f32 1.442695, %v898_v41 }
 0x561   : > { %1389 = vpow2.f32 %v899_v26 }
 0x562   : > { %1391 = vpow2.f32 %v901_v29 }
 0x566   : > { %v1141_v16 = vpop.permute.xlu1 %1140 }
 0x567   : > { %v1143_v59 = vadd.f32 %v1141_v16, %v1136_v43  ;;  %v1144_v45 = vadd.f32 %v1141_v16, %v1137_v20 }
 0x569   : > { %v1145_v34 = vmin.f32 %v1143_v59, 0.0  ;;  %v1146_v19 = vmin.f32 %v1144_v45, 0.0  ;;  %vm1155_vm14 = vcmp.gt.f32.partialorder %v1143_v59, 0.0  ;;  %vm1156_vm15 = vcmp.gt.f32.partialorder %v1144_v45, 0.0 }
 0x56b   : > { %v1147_v58 = vmul.f32 1.442695, %v1145_v34  ;;  %v1149_v6 = vmul.f32 1.442695, %v1146_v19 }
 0x56d   : > { %1393 = vpow2.f32 %v1147_v58 }
 0x56e   : > { %v1390_v63 = vpop.eup %1389  ;;  %1395 = vpow2.f32 %v1149_v6 }
 0x56f   : > { %v1392_v39 = vpop.eup %1391  ;;  %v1309_v36 = vadd.f32 -1.0, %v1390_v63 }
 0x570   : > { %v1310_v11 = vadd.f32 -1.0, %v1392_v39 }
 0x571   : > { %v905_v40 = vmul.f32 1.6732632, %v1309_v36 }
 0x572   : > { %v906_v50 = vmul.f32 1.6732632, %v1310_v11 }
 0x573   : > { %v909_v7 = vsel %vm907_vm12, %v895_v30, %v905_v40 }
 0x574   : > { %v910_v10 = vsel %vm908_vm13, %v896_v22, %v906_v50  ;;  %v911_v35 = vmul.f32 1.050701, %v909_v7 }
 0x575   : > { %v912_v1 = vmul.f32 1.050701, %v910_v10 }
 0x576   : > { %v1161_v27 = vadd.f32 %v911_v35, %v2070_v8 }
 0x577   : > { %v1162_v2 = vadd.f32 %v912_v1, %v2071_v21 }
 0x57a   : > { %v1394_v18 = vpop.eup %1393 }
 0x57b   : > { %v1396_v37 = vpop.eup %1395  ;;  %v1319_v62 = vadd.f32 -1.0, %v1394_v18 }
 0x57c   : > { %v1320_v61 = vadd.f32 -1.0, %v1396_v37 }
 0x57d   : > { %v1153_v3 = vmul.f32 1.6732632, %v1319_v62 }
 0x57e   : > { %v1154_v5 = vmul.f32 1.6732632, %v1320_v61 }
 0x57f   : > { %v1157_v46 = vsel %vm1155_vm14, %v1143_v59, %v1153_v3 }
 0x580   : > { %v1158_v42 = vsel %vm1156_vm15, %v1144_v45, %v1154_v5  ;;  %v1159_v4 = vmul.f32 1.050701, %v1157_v46 }
 0x581   : > { %v1160_v9 = vmul.f32 1.050701, %v1158_v42 }
 0x582   : > { %v1163_v23 = vadd.f32 %v1161_v27, %v1159_v4 }
 0x583   : > { %v1164_v38 = vadd.f32 %v1162_v2, %v1160_v9 }
 0x584   : > { %v1165_v25 = vsel %vm490_vm4, %v1163_v23, 0.0  ;;  %v1170_v44 = vmul.f32 %v1163_v23, %v1163_v23 }
 0x585   : > { %v1166_v56 = vsel %vm490_vm4, %v1164_v38, 0.0  ;;  %v1171_v32 = vmul.f32 %v1164_v38, %v1164_v38 }
 0x586   : > { %v1167_v24 = vadd.f32 %v1166_v56, %v1165_v25  ;;  %v1172_v15 = vsel %vm490_vm4, %v1170_v44, 0.0 }
 0x587   : > { %v1173_v31 = vsel %vm490_vm4, %v1171_v32, 0.0 }
 0x588   : > { %1168 = vadd.xlane.f32.xlu1 %v1167_v24  ;;  %v1174_v49 = vadd.f32 %v1173_v31, %v1172_v15 }
 0x58a   : > { %1175 = vadd.xlane.f32.xlu0 %v1174_v49 }
 0x611   : > { %v1169_v33 = vpop.xlane.xlu1 %1168 }
 0x612   : > { %v1177_v53 = vmul.f32 0.00390625, %v1169_v33 }
 0x613   : > { %v1176_v60 = vpop.xlane.xlu0 %1175 }
 0x614   : > { %v1179_v52 = vmul.f32 %v1177_v53, %v1177_v53  ;;  %v1178_v13 = vmul.f32 0.00390625, %v1176_v60 }
 0x616   : > { %v1180_v54 = vsub.f32 %v1178_v13, %v1179_v52 }
 0x618   : > { %v1181_v47 = vmax.f32 %v1180_v54, 0.0 }
 0x61a   : > { %v1182_v48 = vadd.f32 1e-05, %v1181_v47 }
 0x61c   : > { %1397 = vrsqrt.f32 %v1182_v48 }
 0x629   : > { %v1398_v51 = vpop.eup %1397 }
 0x62a   : > { %v1184_v55 = vmul.f32 %v1398_v51, %v2065_v28 }
 0x62c   : > { %1193 = vperm.xlu1 %1375, %v1184_v55   ;;  %v1185_v12 = vmul.f32 %v1184_v55, %v1177_v53 }
 0x62e   : > { %1187 = vrot.lane.b32.xlu0 %v1185_v12, %s1415_s7 }
 0x630   : > { %1376 = vset.pattern.permute.xlu1 %v2067_v14 }
 0x6a0   : > { %v1188_v17 = vpop.permute.xlu0 %1187 }
 0x6a1   : > { %v1190_v30 = vsub.f32 %v2065_v28, %v1188_v17 }
 0x6a3   : > { %1200 = vperm.xlu1 %1376, %v1190_v30  }
 0x6a7   : > { %v1194_v22 = vpop.permute.xlu1 %1193 }
 0x6a8   : > { %v1196_v57 = vmul.f32 %v1194_v22, %v1163_v23  ;;  %v1197_v41 = vmul.f32 %v1194_v22, %v1164_v38 }
 0x71e   : > { %v1201_v26 = vpop.permute.xlu1 %1200 }
 0x71f   : > { %v1203_v29 = vadd.f32 %v1201_v26, %v1196_v57  ;;  %v1204_v0 = vadd.f32 %v1201_v26, %v1197_v41 }
 0x721   : > { %v1205_v43 = vmin.f32 %v1203_v29, 0.0  ;;  %v1206_v20 = vmin.f32 %v1204_v0, 0.0  ;;  %vm1215_vm0 = vcmp.gt.f32.partialorder %v1203_v29, 0.0  ;;  %vm1216_vm1 = vcmp.gt.f32.partialorder %v1204_v0, 0.0 }
 0x723   : > { %v1207_v16 = vmul.f32 1.442695, %v1205_v43  ;;  %v1209_v59 = vmul.f32 1.442695, %v1206_v20 }
 0x725   : > { %1399 = vpow2.f32 %v1207_v16 }
 0x726   : > { %1401 = vpow2.f32 %v1209_v59 }
 0x732   : > { %v1400_v45 = vpop.eup %1399 }
 0x733   : > { %v1402_v34 = vpop.eup %1401  ;;  %v1321_v14 = vadd.f32 -1.0, %v1400_v45 }
 0x734   : > { %v1322_v19 = vadd.f32 -1.0, %v1402_v34 }
 0x735   : > { %v1213_v58 = vmul.f32 1.6732632, %v1321_v14 }
 0x736   : > { %v1214_v28 = vmul.f32 1.6732632, %v1322_v19 }
 0x737   : > { %v1217_v6 = vsel %vm1215_vm0, %v1203_v29, %v1213_v58 }
 0x738   : > { %v1218_v63 = vsel %vm1216_vm1, %v1204_v0, %v1214_v28  ;;  %v1219_v39 = vmul.f32 1.050701, %v1217_v6 }
 0x739   : > { %v1220_v36 = vmul.f32 1.050701, %v1218_v63 }
 0x73b   : > { %v1223_v11 = vcombine.low %v1219_v39, %v1220_v36 }
 0x73d   : > { %1225 = vst [vmem:[%s251_s15] sm:$0xff] %v1223_v11 }
 0x73e PF: > { %s16_s21 = sadd.s32 1, %s1409_s21  }
 0x73f   : > { %p13_p4 = scmp.ge.s32.totalorder %s16_s21, 4  }
 0x741   :  { %15 = sbr.rel (!%p13_p4) target bundleno = 1 (0x1), region = 89 }

</bundles_post_ra>
